<compile_context>
chip_gen: v5e
topology: v5e:2x2
jax: 0.10.0
libtpu: 0.0.40
codegen_flags: <defaults>
</compile_context>

<pallas_src>
import functools

import jax
import jax.numpy as jnp
from jax.experimental import pallas as pl
from jax.experimental.pallas import tpu as pltpu


def _self_attention_kernel(x_ref, wqT_ref, wk_ref, wvT_ref,
                           bq_ref, bk_ref, bv_ref, gamma_ref,
                           out_ref, attn_ref,
                           q_sc, k_sc, v_sc):
    # x_ref:    (C, N)  f32 per-batch input slab (resident across q tiles)
    # wqT_ref:  (C, d)  compute-dtype, pre-transposed
    # wk_ref:   (d, C)  compute-dtype
    # wvT_ref:  (C, C)  compute-dtype, pre-transposed
    # bq_ref:   (1, d)  f32;  bk_ref: (d, 1) f32;  bv_ref: (1, C) f32
    # gamma_ref: SMEM (1,) f32 residual gain
    # out_ref:  (C, TQ) f32 output tile (channel-major, lane-dense)
    # attn_ref: (TQ, N) bf16 attention rows for this query tile
    # q_sc: (N, d), k_sc: (d, N), v_sc: (N, C)  compute-dtype scratch
    t = pl.program_id(1)
    d = k_sc.shape[0]
    tq = out_ref.shape[1]
    cdt = q_sc.dtype

    @pl.when(t == 0)
    def _():
        # Per-batch Q/K/V projection, once, in compute dtype, directly into
        # scratch (no (2d+C, N) f32 intermediate, no large transposes).
        x_c = x_ref[...].astype(cdt)                                   # (C, N)
        xT_c = x_c.T                                                   # (N, C)
        q_sc[...] = (jnp.dot(xT_c, wqT_ref[...],
                             preferred_element_type=jnp.float32)
                     + bq_ref[...]).astype(cdt)                        # (N, d)
        v_sc[...] = (jnp.dot(xT_c, wvT_ref[...],
                             preferred_element_type=jnp.float32)
                     + bv_ref[...]).astype(cdt)                        # (N, C)
        k_sc[...] = (jnp.dot(wk_ref[...], x_c,
                             preferred_element_type=jnp.float32)
                     + bk_ref[...]).astype(cdt)                        # (d, N)

    start = pl.multiple_of(t * tq, tq)
    q_tile = q_sc[pl.ds(start, tq), :]                                 # (TQ, d)

    # energy (TQ, N): contract d in canonical MXU orientation, scale 1/sqrt(d).
    scale = 1.0 / jnp.sqrt(jnp.float32(d))
    energy = jnp.dot(q_tile, k_sc[...],
                     preferred_element_type=jnp.float32) * scale

    # Softmax over keys (f32 math is safe on all generations; EUP approx
    # reciprocal for the denominator).
    # TODO(synk): on v6e/v7x a bf16 exp roughly doubles EUP throughput.
    m = jnp.max(energy, axis=-1, keepdims=True)
    e = jnp.exp(energy - m)
    attn = e * pl.reciprocal(jnp.sum(e, axis=-1, keepdims=True), approx=True)
    # bf16 writeback: halves the dominant B*N^2 HBM traffic + the VMEM tile.
    attn_ref[...] = attn.astype(attn_ref.dtype)

    # (TQ, C) = attn @ v_nc  -> no (N, N) transpose; only the small (TQ, C)
    # result is transposed back to channel-major.
    out_nc = jnp.dot(attn.astype(cdt), v_sc[...],
                     preferred_element_type=jnp.float32)               # (TQ, C)

    x_tile = x_ref[:, pl.ds(start, tq)]                                # (C, TQ)
    out_ref[...] = gamma_ref[0] * out_nc.T + x_tile


def _pick_tq(n, attn_dtype):
    """Largest query tile from {512, 256, 128} dividing N under a VMEM budget
    that is safe even for v7x's 64 MiB VMEM."""
    ab = jnp.dtype(attn_dtype).itemsize
    budget = 28 << 20
    for tq in (512, 256, 128):
        if n % tq == 0 and (2 * tq * n * ab + 2 * tq * n * 4) <= budget:
            return tq
    # TODO(synk): pad N to a multiple of 128 (masking padded keys with -inf)
    # instead of falling back to a single query tile for non-aligned H*W.
    return n


def _vmem_limit_bytes(C, N, d, tq, compute_dtype, attn_dtype):
    cb = jnp.dtype(compute_dtype).itemsize
    ab = jnp.dtype(attn_dtype).itemsize
    x_b = 2 * C * N * 4                        # double-buffered input slab
    out_b = 2 * C * tq * 4                     # double-buffered output tile
    attn_b = 2 * tq * N * ab                   # double-buffered attn tile
    w_b = 2 * (2 * C * d + C * C) * cb + 2 * (2 * d + C + 2) * 4
    scratch_b = (2 * N * d + N * C) * cb       # q/k/v scratch (single buffer)
    transient_b = N * C * cb + 2 * tq * N * 4  # xT copy + f32 softmax temps
    need = x_b + out_b + attn_b + w_b + scratch_b + transient_b
    return int(min(max(int(need * 1.4) + (4 << 20), 16 << 20), 112 << 20))


@functools.partial(jax.jit,
                   static_argnames=("tq", "compute_dtype", "attn_dtype"))
def self_attention_pallas(x, wq, bq, wk, bk, wv, bv, gamma, *,
                          tq=None, compute_dtype=None,
                          attn_dtype=jnp.bfloat16):
    """x: (B, C, H, W) f32. Returns (output (B,C,H,W) f32, attention (B,N,N))."""
    B, C, H, W = x.shape
    N = H * W
    d = C // 2
    if compute_dtype is None:
        # bf16 MXU operands on real TPUs; f32 fallback for CPU/interpret runs
        # (CPU DotThunk does not support bf16 x bf16 = f32).
        compute_dtype = (jnp.bfloat16 if jax.default_backend() == "tpu"
                         else jnp.float32)
    if tq is None:
        tq = _pick_tq(N, attn_dtype)
    assert N % tq == 0, "query-tile size must divide H*W"
    nt = N // tq

    x_flat = x.reshape(B, C, N).astype(jnp.float32)
    wqT = wq.T.astype(compute_dtype)                     # (C, d)
    wk_c = wk.astype(compute_dtype)                      # (d, C)
    wvT = wv.T.astype(compute_dtype)                     # (C, C)
    bq_r = bq.reshape(1, d).astype(jnp.float32)
    bk_c = bk.reshape(d, 1).astype(jnp.float32)
    bv_r = bv.reshape(1, C).astype(jnp.float32)
    gamma1 = gamma.reshape((1,)).astype(jnp.float32)

    grid_spec = pltpu.PrefetchScalarGridSpec(
        num_scalar_prefetch=0,
        grid=(B, nt),
        in_specs=[
            pl.BlockSpec((None, C, N), lambda b, t: (b, 0, 0)),   # x per batch
            pl.BlockSpec((C, d), lambda b, t: (0, 0)),            # wq^T
            pl.BlockSpec((d, C), lambda b, t: (0, 0)),            # wk
            pl.BlockSpec((C, C), lambda b, t: (0, 0)),            # wv^T
            pl.BlockSpec((1, d), lambda b, t: (0, 0)),            # bq
            pl.BlockSpec((d, 1), lambda b, t: (0, 0)),            # bk
            pl.BlockSpec((1, C), lambda b, t: (0, 0)),            # bv
            pl.BlockSpec(memory_space=pltpu.MemorySpace.SMEM),    # gamma
        ],
        out_specs=[
            pl.BlockSpec((None, C, tq), lambda b, t: (b, 0, t)),  # output tile
            pl.BlockSpec((None, tq, N), lambda b, t: (b, t, 0)),  # attn tile
        ],
        scratch_shapes=[
            pltpu.VMEM((N, d), compute_dtype),    # q  (N, d)
            pltpu.VMEM((d, N), compute_dtype),    # k  (d, N)
            pltpu.VMEM((N, C), compute_dtype),    # v  (N, C)
        ],
    )

    attn_bytes = jnp.dtype(attn_dtype).itemsize
    cost = pl.CostEstimate(
        flops=int(2 * B * N * N * (d + C) + 2 * B * N * C * (2 * d + C)),
        transcendentals=int(B * N * N),
        bytes_accessed=int(2 * B * C * N * 4 + B * N * N * attn_bytes),
    )

    out_flat, attn = pl.pallas_call(
        _self_attention_kernel,
        out_shape=(
            jax.ShapeDtypeStruct((B, C, N), jnp.float32),
            jax.ShapeDtypeStruct((B, N, N), attn_dtype),
        ),
        grid_spec=grid_spec,
        compiler_params=pltpu.CompilerParams(
            dimension_semantics=("parallel", "arbitrary"),
            vmem_limit_bytes=_vmem_limit_bytes(C, N, d, tq,
                                               compute_dtype, attn_dtype),
        ),
        cost_estimate=cost,
    )(x_flat, wqT, wk_c, wvT, bq_r, bk_c, bv_r, gamma1)

    return out_flat.reshape(B, C, H, W), attn


def _reference(x, wq, bq, wk, bk, wv, bv, gamma):
    """Pure-JAX (f32) replica of the PyTorch forward, for correctness checking."""
    B, C, H, W = x.shape
    N = H * W
    d = C // 2
    xf = x.reshape(B, C, N)
    q = jnp.einsum('dc,bcn->bdn', wq, xf) + bq[None, :, None]   # (B, d, N)
    k = jnp.einsum('dc,bcn->bdn', wk, xf) + bk[None, :, None]   # (B, d, N)
    v = jnp.einsum('oc,bcn->bon', wv, xf) + bv[None, :, None]   # (B, C, N)
    energy = jnp.einsum('bdn,bdm->bnm', q, k) / jnp.sqrt(jnp.float32(d))
    attn = jax.nn.softmax(energy, axis=-1)                      # (B, N, N)
    out = jnp.einsum('bcm,bnm->bcn', v, attn)                   # (B, C, N)
    out = gamma[0] * out + xf
    return out.reshape(B, C, H, W), attn


if __name__ == "__main__":
    B, C, H, W = 2, 8, 16, 16
    d = C // 2
    N = H * W

    key = jax.random.PRNGKey(0)
    kx, kwq, kbq, kwk, kbk, kwv, kbv = jax.random.split(key, 7)

    x = jax.random.normal(kx, (B, C, H, W), dtype=jnp.float32)

    bound = 1.0 / jnp.sqrt(jnp.float32(C))
    wq = jax.random.uniform(kwq, (d, C), jnp.float32, -bound, bound)
    bq = jax.random.uniform(kbq, (d,), jnp.float32, -bound, bound)
    wk = jax.random.uniform(kwk, (d, C), jnp.float32, -bound, bound)
    bk = jax.random.uniform(kbk, (d,), jnp.float32, -bound, bound)
    wv = jax.random.uniform(kwv, (C, C), jnp.float32, -bound, bound)
    bv = jax.random.uniform(kbv, (C,), jnp.float32, -bound, bound)
    # nn.Parameter(torch.zeros(1)) initialises gamma to 0; use a non-zero value
    # here so the attention-output/residual path is actually exercised.
    gamma = jnp.array([0.7], dtype=jnp.float32)

    # tq=128 so the multi-tile (N // TQ = 2) path is exercised at this size.
    out, attn = self_attention_pallas(x, wq, bq, wk, bk, wv, bv, gamma, tq=128)
    out = jax.block_until_ready(out)
    attn = jax.block_until_ready(attn)

    out_ref, attn_ref = _reference(x, wq, bq, wk, bk, wv, bv, gamma)
    assert out.shape == (B, C, H, W) and attn.shape == (B, N, N)
    attn_f32 = attn.astype(jnp.float32)
    # bf16 attn output (+ possibly bf16 MXU operands / approx reciprocal on
    # real TPUs) -> loosened tolerances vs the f32 reference.
    assert jnp.allclose(attn_f32, attn_ref, atol=2e-2, rtol=5e-2), \
        float(jnp.max(jnp.abs(attn_f32 - attn_ref)))
    assert jnp.allclose(out, out_ref, atol=3e-2, rtol=3e-2), \
        float(jnp.max(jnp.abs(out - out_ref)))

    print("KERNEL_OK")
</pallas_src>

<mosaic_0001>
module attributes {stable_mosaic.version = 11 : i64} {
  func.func @_self_attention_kernel(%arg0: i32, %arg1: i32, %arg2: memref<1x8x256xf32, #tpu.memory_space<vmem>>, %arg3: memref<8x4xf32, #tpu.memory_space<vmem>>, %arg4: memref<4x8xf32, #tpu.memory_space<vmem>>, %arg5: memref<8x8xf32, #tpu.memory_space<vmem>>, %arg6: memref<1x4xf32, #tpu.memory_space<vmem>>, %arg7: memref<4x1xf32, #tpu.memory_space<vmem>>, %arg8: memref<1x8xf32, #tpu.memory_space<vmem>>, %arg9: memref<1xf32, #tpu.memory_space<smem>>, %arg10: memref<1x8x128xf32, #tpu.memory_space<vmem>>, %arg11: memref<1x128x256xbf16, #tpu.memory_space<vmem>>, %arg12: memref<256x4xf32, #tpu.memory_space<vmem>>, %arg13: memref<4x256xf32, #tpu.memory_space<vmem>>, %arg14: memref<256x8xf32, #tpu.memory_space<vmem>>) attributes {dimension_semantics = [#tpu.dimension_semantics<parallel>, #tpu.dimension_semantics<arbitrary>], iteration_bounds = array<i64: 2, 2>, scalar_prefetch = 0 : i64, scratch_operands = 3 : i64, tpu.core_type = #tpu.core_type<tc>, window_params = [{transform_indices = @transform_0, window_bounds = array<i64: 1, 8, 256>}, {pipeline_mode = #tpu.pipeline_mode<synchronous>, transform_indices = @transform_1, window_bounds = array<i64: 8, 4>}, {pipeline_mode = #tpu.pipeline_mode<synchronous>, transform_indices = @transform_2, window_bounds = array<i64: 4, 8>}, {pipeline_mode = #tpu.pipeline_mode<synchronous>, transform_indices = @transform_3, window_bounds = array<i64: 8, 8>}, {pipeline_mode = #tpu.pipeline_mode<synchronous>, transform_indices = @transform_4, window_bounds = array<i64: 1, 4>}, {pipeline_mode = #tpu.pipeline_mode<synchronous>, transform_indices = @transform_5, window_bounds = array<i64: 4, 1>}, {pipeline_mode = #tpu.pipeline_mode<synchronous>, transform_indices = @transform_6, window_bounds = array<i64: 1, 8>}, {transform_indices = @transform_7, window_bounds = array<i64: 1>}, {transform_indices = @transform_8, window_bounds = array<i64: 1, 8, 128>}, {transform_indices = @transform_9, window_bounds = array<i64: 1, 128, 256>}]} {
    %c0_i32 = arith.constant 0 : i32
    %0 = arith.cmpi eq, %arg1, %c0_i32 : i32
    %1 = arith.extui %0 : i1 to i32
    %c0_i32_0 = arith.constant 0 : i32
    %2 = arith.cmpi ne, %1, %c0_i32_0 : i32
    scf.if %2 {
      %c0_19 = arith.constant 0 : index
      %c0_20 = arith.constant 0 : index
      %c0_21 = arith.constant 0 : index
      %40 = vector.load %arg2[%c0_19, %c0_20, %c0_21] : memref<1x8x256xf32, #tpu.memory_space<vmem>>, vector<1x8x256xf32>
      %41 = vector.shape_cast %40 : vector<1x8x256xf32> to vector<8x256xf32>
      %42 = tpu.transpose %41, [1, 0] : vector<8x256xf32> -> vector<256x8xf32>
      %c0_22 = arith.constant 0 : index
      %c0_23 = arith.constant 0 : index
      %43 = vector.load %arg3[%c0_22, %c0_23] : memref<8x4xf32, #tpu.memory_space<vmem>>, vector<8x4xf32>
      %cst_24 = arith.constant dense<0.000000e+00> : vector<256x4xf32>
      %44 = tpu.matmul %42, %43, %cst_24 {dimension_numbers = #tpu.dot_dimension_numbers<[1], [0], [0], [1], [0, 0, 1, 1], [], []>} : vector<256x8xf32>, vector<8x4xf32>, vector<256x4xf32> -> vector<256x4xf32>
      %c0_25 = arith.constant 0 : index
      %c0_26 = arith.constant 0 : index
      %45 = vector.load %arg6[%c0_25, %c0_26] : memref<1x4xf32, #tpu.memory_space<vmem>>, vector<1x4xf32>
      %46 = vector.broadcast %45 : vector<1x4xf32> to vector<256x4xf32>
      %47 = arith.addf %44, %46 : vector<256x4xf32>
      %c0_27 = arith.constant 0 : index
      %c0_28 = arith.constant 0 : index
      %48 = vector.load %arg12[%c0_27, %c0_28] : memref<256x4xf32, #tpu.memory_space<vmem>>, vector<256x4xf32>
      tpu.vector_store %arg12[%c0_27, %c0_28], %47 {strides = array<i32>} : memref<256x4xf32, #tpu.memory_space<vmem>>, vector<256x4xf32>,
      %c0_29 = arith.constant 0 : index
      %c0_30 = arith.constant 0 : index
      %49 = vector.load %arg5[%c0_29, %c0_30] : memref<8x8xf32, #tpu.memory_space<vmem>>, vector<8x8xf32>
      %cst_31 = arith.constant dense<0.000000e+00> : vector<256x8xf32>
      %50 = tpu.matmul %42, %49, %cst_31 {dimension_numbers = #tpu.dot_dimension_numbers<[1], [0], [0], [1], [0, 0, 1, 1], [], []>} : vector<256x8xf32>, vector<8x8xf32>, vector<256x8xf32> -> vector<256x8xf32>
      %c0_32 = arith.constant 0 : index
      %c0_33 = arith.constant 0 : index
      %51 = vector.load %arg8[%c0_32, %c0_33] : memref<1x8xf32, #tpu.memory_space<vmem>>, vector<1x8xf32>
      %52 = vector.broadcast %51 : vector<1x8xf32> to vector<256x8xf32>
      %53 = arith.addf %50, %52 : vector<256x8xf32>
      %c0_34 = arith.constant 0 : index
      %c0_35 = arith.constant 0 : index
      %54 = vector.load %arg14[%c0_34, %c0_35] : memref<256x8xf32, #tpu.memory_space<vmem>>, vector<256x8xf32>
      tpu.vector_store %arg14[%c0_34, %c0_35], %53 {strides = array<i32>} : memref<256x8xf32, #tpu.memory_space<vmem>>, vector<256x8xf32>,
      %c0_36 = arith.constant 0 : index
      %c0_37 = arith.constant 0 : index
      %55 = vector.load %arg4[%c0_36, %c0_37] : memref<4x8xf32, #tpu.memory_space<vmem>>, vector<4x8xf32>
      %cst_38 = arith.constant dense<0.000000e+00> : vector<4x256xf32>
      %56 = tpu.matmul %55, %41, %cst_38 {dimension_numbers = #tpu.dot_dimension_numbers<[1], [0], [0], [1], [0, 0, 1, 1], [], []>} : vector<4x8xf32>, vector<8x256xf32>, vector<4x256xf32> -> vector<4x256xf32>
      %c0_39 = arith.constant 0 : index
      %c0_40 = arith.constant 0 : index
      %57 = vector.load %arg7[%c0_39, %c0_40] : memref<4x1xf32, #tpu.memory_space<vmem>>, vector<4x1xf32>
      %58 = vector.broadcast %57 : vector<4x1xf32> to vector<4x256xf32>
      %59 = arith.addf %56, %58 : vector<4x256xf32>
      %c0_41 = arith.constant 0 : index
      %c0_42 = arith.constant 0 : index
      %60 = vector.load %arg13[%c0_41, %c0_42] : memref<4x256xf32, #tpu.memory_space<vmem>>, vector<4x256xf32>
      tpu.vector_store %arg13[%c0_41, %c0_42], %59 {strides = array<i32>} : memref<4x256xf32, #tpu.memory_space<vmem>>, vector<4x256xf32>,
    } else {
    }
    %c128_i32 = arith.constant 128 : i32
    %3 = arith.muli %arg1, %c128_i32 : i32
    %4 = tpu.assume_multiple %3, 128 : i32
    %5 = arith.index_cast %4 : i32 to index
    %c0 = arith.constant 0 : index
    %6 = vector.load %arg12[%5, %c0] : memref<256x4xf32, #tpu.memory_space<vmem>>, vector<128x4xf32>
    %cst = arith.constant 4.000000e+00 : f32
    %7 = math.sqrt %cst : f32
    %cst_1 = arith.constant 1.000000e+00 : f32
    %8 = arith.divf %cst_1, %7 : f32
    %c0_2 = arith.constant 0 : index
    %c0_3 = arith.constant 0 : index
    %9 = vector.load %arg13[%c0_2, %c0_3] : memref<4x256xf32, #tpu.memory_space<vmem>>, vector<4x256xf32>
    %cst_4 = arith.constant dense<0.000000e+00> : vector<128x256xf32>
    %10 = tpu.matmul %6, %9, %cst_4 {dimension_numbers = #tpu.dot_dimension_numbers<[1], [0], [0], [1], [0, 0, 1, 1], [], []>} : vector<128x4xf32>, vector<4x256xf32>, vector<128x256xf32> -> vector<128x256xf32>
    %11 = vector.broadcast %8 : f32 to vector<128x256xf32>
    %12 = arith.mulf %10, %11 : vector<128x256xf32>
    %cst_5 = arith.constant dense<0xFF800000> : vector<128xf32>
    %13 = vector.multi_reduction <maximumf>, %12, %cst_5 [1] : vector<128x256xf32> to vector<128xf32>
    %14 = vector.shape_cast %13 : vector<128xf32> to vector<128x1xf32>
    %15 = vector.broadcast %14 : vector<128x1xf32> to vector<128x256xf32>
    %16 = arith.subf %12, %15 : vector<128x256xf32>
    %17 = math.exp %16 : vector<128x256xf32>
    %cst_6 = arith.constant dense<0.000000e+00> : vector<128xf32>
    %18 = vector.multi_reduction <add>, %17, %cst_6 [1] : vector<128x256xf32> to vector<128xf32>
    %19 = vector.shape_cast %18 : vector<128xf32> to vector<128x1xf32>
    %20 = tpu.reciprocal %19 {approx = true} : vector<128x1xf32> -> vector<128x1xf32>
    %21 = vector.broadcast %20 : vector<128x1xf32> to vector<128x256xf32>
    %22 = arith.mulf %17, %21 : vector<128x256xf32>
    %23 = arith.truncf %22 : vector<128x256xf32> to vector<128x256xbf16>
    %c0_7 = arith.constant 0 : index
    %c0_8 = arith.constant 0 : index
    %c0_9 = arith.constant 0 : index
    %24 = vector.load %arg11[%c0_7, %c0_8, %c0_9] : memref<1x128x256xbf16, #tpu.memory_space<vmem>>, vector<1x128x256xbf16>
    %25 = vector.shape_cast %24 : vector<1x128x256xbf16> to vector<128x256xbf16>
    %26 = vector.shape_cast %23 : vector<128x256xbf16> to vector<1x128x256xbf16>
    tpu.vector_store %arg11[%c0_7, %c0_8, %c0_9], %26 {strides = array<i32>} : memref<1x128x256xbf16, #tpu.memory_space<vmem>>, vector<1x128x256xbf16>,
    %c0_10 = arith.constant 0 : index
    %c0_11 = arith.constant 0 : index
    %27 = vector.load %arg14[%c0_10, %c0_11] : memref<256x8xf32, #tpu.memory_space<vmem>>, vector<256x8xf32>
    %cst_12 = arith.constant dense<0.000000e+00> : vector<128x8xf32>
    %28 = tpu.matmul %22, %27, %cst_12 {dimension_numbers = #tpu.dot_dimension_numbers<[1], [0], [0], [1], [0, 0, 1, 1], [], []>} : vector<128x256xf32>, vector<256x8xf32>, vector<128x8xf32> -> vector<128x8xf32>
    %c0_13 = arith.constant 0 : index
    %c0_14 = arith.constant 0 : index
    %29 = arith.index_cast %4 : i32 to index
    %30 = vector.load %arg2[%c0_13, %c0_14, %29] : memref<1x8x256xf32, #tpu.memory_space<vmem>>, vector<1x8x128xf32>
    %31 = vector.shape_cast %30 : vector<1x8x128xf32> to vector<8x128xf32>
    %c0_15 = arith.constant 0 : index
    %32 = memref.load %arg9[%c0_15] : memref<1xf32, #tpu.memory_space<smem>>
    %33 = tpu.transpose %28, [1, 0] : vector<128x8xf32> -> vector<8x128xf32>
    %34 = vector.broadcast %32 : f32 to vector<8x128xf32>
    %35 = arith.mulf %34, %33 : vector<8x128xf32>
    %36 = arith.addf %35, %31 : vector<8x128xf32>
    %c0_16 = arith.constant 0 : index
    %c0_17 = arith.constant 0 : index
    %c0_18 = arith.constant 0 : index
    %37 = vector.load %arg10[%c0_16, %c0_17, %c0_18] : memref<1x8x128xf32, #tpu.memory_space<vmem>>, vector<1x8x128xf32>
    %38 = vector.shape_cast %37 : vector<1x8x128xf32> to vector<8x128xf32>
    %39 = vector.shape_cast %36 : vector<8x128xf32> to vector<1x8x128xf32>
    tpu.vector_store %arg10[%c0_16, %c0_17, %c0_18], %39 {strides = array<i32>} : memref<1x8x128xf32, #tpu.memory_space<vmem>>, vector<1x8x128xf32>,
    return
  }
  func.func @transform_0(%arg0: i32, %arg1: i32) -> (i32, i32, i32) {
    %c0_i32 = arith.constant 0 : i32
    %c0_i32_0 = arith.constant 0 : i32
    %c0_i32_1 = arith.constant 0 : i32
    return %arg0, %c0_i32, %c0_i32_0 : i32, i32, i32
  }
  func.func @transform_1(%arg0: i32, %arg1: i32) -> (i32, i32) {
    %c0_i32 = arith.constant 0 : i32
    %c0_i32_0 = arith.constant 0 : i32
    %c0_i32_1 = arith.constant 0 : i32
    return %c0_i32, %c0_i32_0 : i32, i32
  }
  func.func @transform_2(%arg0: i32, %arg1: i32) -> (i32, i32) {
    %c0_i32 = arith.constant 0 : i32
    %c0_i32_0 = arith.constant 0 : i32
    %c0_i32_1 = arith.constant 0 : i32
    return %c0_i32, %c0_i32_0 : i32, i32
  }
  func.func @transform_3(%arg0: i32, %arg1: i32) -> (i32, i32) {
    %c0_i32 = arith.constant 0 : i32
    %c0_i32_0 = arith.constant 0 : i32
    %c0_i32_1 = arith.constant 0 : i32
    return %c0_i32, %c0_i32_0 : i32, i32
  }
  func.func @transform_4(%arg0: i32, %arg1: i32) -> (i32, i32) {
    %c0_i32 = arith.constant 0 : i32
    %c0_i32_0 = arith.constant 0 : i32
    %c0_i32_1 = arith.constant 0 : i32
    return %c0_i32, %c0_i32_0 : i32, i32
  }
  func.func @transform_5(%arg0: i32, %arg1: i32) -> (i32, i32) {
    %c0_i32 = arith.constant 0 : i32
    %c0_i32_0 = arith.constant 0 : i32
    %c0_i32_1 = arith.constant 0 : i32
    return %c0_i32, %c0_i32_0 : i32, i32
  }
  func.func @transform_6(%arg0: i32, %arg1: i32) -> (i32, i32) {
    %c0_i32 = arith.constant 0 : i32
    %c0_i32_0 = arith.constant 0 : i32
    %c0_i32_1 = arith.constant 0 : i32
    return %c0_i32, %c0_i32_0 : i32, i32
  }
  func.func @transform_7(%arg0: i32, %arg1: i32) -> i32 {
    %c0_i32 = arith.constant 0 : i32
    %c0_i32_0 = arith.constant 0 : i32
    return %c0_i32 : i32
  }
  func.func @transform_8(%arg0: i32, %arg1: i32) -> (i32, i32, i32) {
    %c0_i32 = arith.constant 0 : i32
    %c0_i32_0 = arith.constant 0 : i32
    return %arg0, %c0_i32, %arg1 : i32, i32, i32
  }
  func.func @transform_9(%arg0: i32, %arg1: i32) -> (i32, i32, i32) {
    %c0_i32 = arith.constant 0 : i32
    %c0_i32_0 = arith.constant 0 : i32
    return %arg0, %arg1, %c0_i32 : i32, i32, i32
  }
}

</mosaic_0001>

<bundles_post_ra>
// kernel: self_attention_pallas.1
= control target key start
LH: loop header
LB: loop body
LE: loop exit
PB: predicated region body
PF: predicated region fallthrough
CT: control target
= control target key end

     0   :  { %s2931_s0 = inlined_call_operand.vmem [shape: f32[2,8,256], index: 0, kind: input, shape index: {}]   ;;  %s2932_s1 = inlined_call_operand.vmem [shape: f32[8,4], index: 1, kind: input, shape index: {}]   ;;  %s2933_s2 = inlined_call_operand.vmem [shape: f32[4,8], index: 2, kind: input, shape index: {}]   ;;  %s2934_s3 = inlined_call_operand.vmem [shape: f32[8,8], index: 3, kind: input, shape index: {}]   ;;  %s2935_s4 = inlined_call_operand.vmem [shape: f32[1,4], index: 4, kind: input, shape index: {}]   ;;  %s2936_s5 = inlined_call_operand.vmem [shape: f32[4,1], index: 5, kind: input, shape index: {}]   ;;  %s2937_s6 = inlined_call_operand.vmem [shape: f32[1,8], index: 6, kind: input, shape index: {}]   ;;  %s2938_s7 = inlined_call_operand.<no memory space> [shape: f32[1], index: 7, kind: input, shape index: {}]   ;;  %s2939_s8 = inlined_call_operand.vmem [shape: f32[2,8,256], index: 8, kind: output, shape index: {0}]   ;;  %s2940_s9 = inlined_call_operand.hbm [shape: bf16[2,256,256], index: 9, kind: output, shape index: {1}]  }
   0x1   :  { %15 = sst [smem:[#allocation5]] %s2938_s7 }
   0x2   :  { %16 = vsyncpa [#allocation7], 0 }
   0x3   :  { %18 = vsyncpa [#allocation7 + $0x1], 0  ;;  %s2237_s11 = smov 0   ;;  %s2239_s12 = smov 0  }
   0x4   :  { %s2241_s13 = smov 0   ;;  %s2243_s14 = smov 0  }
   0x5   :  { %s2245_s15 = smov 0   ;;  %s2247_s16 = smov 0  }
   0x6   :  { %s2249_s17 = smov 0   ;;  %s2251_s18 = smov 0  }
   0x7 LB: > { %2947 = sst [smem:[#allocation9_spill]] %s2159_s13  ;;  %s1754_s7 = sadd.s32 4294967295, %s2179_s18   ;;  %s2179_s18 = sphi %s2251_s18, %s24_s18   ;;  %s2175_s17 = sphi %s2249_s17, %s2961_s17   ;;  %s2171_s16 = sphi %s2247_s16, %s2960_s16   ;;  %s2167_s15 = sphi %s2245_s15, %s2959_s15   ;;  %s2163_s14 = sphi %s2243_s14, %s2964_s14   ;;  %s2159_s13 = sphi %s2241_s13, %s2957_s13   ;;  %s2155_s12 = sphi %s2239_s12, %s2963_s12   ;;  %s2151_s11 = sphi %s2237_s11, %s2962_s11  }
   0x8   : > { %2948 = sst [smem:[#allocation10_spill]] %s2171_s16  ;;  %s1755_s19 = sadd.s32 4294967294, %s2179_s18  }
   0x9   : > { %2949 = sst [smem:[#allocation11_spill]] %s2175_s17  ;;  %s33_s20 = sadd.s32 1, %s2171_s16 }
   0xa   : > { %p34_p0 = scmp.ge.s32.totalorder %s33_s20, 2  ;;  %s36_s21 = sadd.s32 1, %s2175_s17 }
   0xb   : > { %p256_p1 = scmp.ne.s32.totalorder %s2159_s13, %s2155_s12  ;;  %p257_p2 = scmp.eq.s32.totalorder %s1754_s7, 3 }
   0xc   : > { %s2966_s20 = smov (%p34_p0, %s33_s20), 0  ;;  %s2968_s21 = smov (!%p34_p0, %s36_s21), %s2175_s17 }
   0xd   : > { %2950 = sst [smem:[#allocation12_spill]] %s2966_s20  ;;  %s242_s22 = ssub.s32 %s2171_s16, %s2966_s20 }
   0xe   : > { %p2288_p3 = por %p257_p2, %p256_p1  ;;  %p38_p4 = scmp.ge.s32.totalorder %s2968_s21, 2 }
   0xf   : > { %p262_p5 = scmp.ne.s32.totalorder %s2155_s12, %s2151_s11  ;;  %p263_p6 = scmp.eq.s32.totalorder %s1755_s19, 3 }
  0x10   : > { %p1758_p7 = scmp.ge.s32.totalorder %s2179_s18, 1  ;;  %s2970_s21 = smov (%p38_p4, %s2968_s21), 0 }
  0x11   : > { %2952 = sst [smem:[#allocation13_spill]] %s2970_s21  ;;  %p2297_p8 = por %p263_p6, %p262_p5 }
  0x12   : > { %p310_p9 = scmp.lt.s32.totalorder %s2179_s18, 5  ;;  %s241_s25 = ssub.s32 %s2175_s17, %s2970_s21 }
  0x13   : > { %s246_s26 = sadd.s32 1, %s2159_s13  ;;  %s243_s27 = sor.u32 %s242_s22, %s241_s25 }
  0x14   : > { %p311_p10 = pnand %p1758_p7, %p310_p9  ;;  %p244_p11 = scmp.eq.s32.totalorder %s243_s27, 0 }
  0x15   : > { %s351_s29 = sand.u32 (!%p311_p10), 1, %s2155_s12   ;;  %p354_p12 = scmp.lt.s32.totalorder (!%p311_p10), %s2167_s15, 1 }
  0x16   : > { %s2306_s28 = scalar_select %p244_p11, %s2159_s13, %s246_s26  }
  0x17   : > { %314 = sbr.rel (%p311_p10) target bundleno = 1425 (0x591), region = 52  ;;  %s1759_s30 = sshll.u32 (!%p311_p10), %s351_s29, 7 }
  0x18   : > { %2954 = sst [smem:[#allocation14_spill]] %s2306_s28  ;;  %p361_p13 = scmp.lt.s32.totalorder (!%p311_p10), %s2163_s14, 1 }
  0x19   : > { %s2325_s13 = scalar_lea.vmem (!%p311_p10), [#allocation6], %s1759_s30  ;;  %p1764_p0 = scmp.ne.s32.totalorder (!%p311_p10), %s2163_s14, 0 }
  0x1c   : > { %s355_s10 = scalar_select %p354_p12, %s2167_s15, 1 }
  0x1d   : > { %s362_s7 = scalar_select %p361_p13, %s2163_s14, 1 }
  0x1e   : > { %s1874_s19 = sshll.u32 %s355_s10, 4  ;;  %s1762_s22 = sshll.u32 %s355_s10, 1 }
  0x1f   : > { %s2318_s26 = scalar_lea.vmem %s2931_s0, %s1874_s19  ;;  %s364_s21 = sadd.s32 %s1762_s22, %s362_s7 }
  0x20   : > { %s1763_s20 = sshll.u32 %s364_s21, 3  ;;  %371 = sbr.rel (%p1764_p0) target bundleno = 589 (0x24d), region = 56 }
  0x21   : > { %s2323_s28 = scalar_lea.vmem %s2939_s8, %s1763_s20 }
  0x25   : > { %v373_v0 = vld [vmem:[%s2318_s26 + $0x8] sm:$0xff]  ;;  %v372_v1 = vld [vmem:[%s2318_s26] sm:$0xff]  ;;  %vm443_vm0 = vcmask 64512   ;;  %vm653_vm1 = vcmask 31744   ;;  %vm889_vm2 = vcmask 1043456  }
  0x26   : > { %406 = vxpose.xlu0.b32.start.end [1/1] (short) %v373_v0, 128  ;;  %v438_v2 = vld [vmem:[%s2932_s1] sm:$0xff] }
  0x27   : > { %v686_v3 = vld [vmem:[%s2934_s3] sm:$0xff]  ;;  %1876 = vmatpush.msra.mxu2 %v438_v2  ;;  %555 = vmatpush.msra.mxu0 %v438_v2 }
  0x28   : > { %1877 = vmatpush.msra.mxu3 %v686_v3  ;;  %706 = vmatpush.msra.mxu1 %v686_v3  ;;  %v2375_v22 = vld [vmem:[%s2935_s4] ss:$0 sm:$0xff] }
  0x29   : > { %861 = vmatpush.msrb.mxu2 %v372_v1  ;;  %v2380_v23 = vld [vmem:[%s2937_s6] ss:$0 sm:$0xff] }
  0x2a   : > { %881 = vmatpush.msrb.mxu3 %v373_v0 }
  0xa6   : > { %374 = vxpose.xlu0.b32.start.end [1/1] (short) %v372_v1, 128 }
  0xca   : > { %v2336_v4 = vpop.trf.xlu0 }
  0xd2   : > { %v423_v5 = vpop.trf.xlu0 }
  0xd3   : > { %1782 = vmatmul.msk.f32.vlgmr.msra.gmra.mxu2 %vm443_vm0, %v423_v5  ;;  %1814 = vmatmul.msk.f32.vlgmr.msra.gmra.mxu3 %vm443_vm0, %v423_v5 }
  0xda   : > { %v424_v6 = vpop.trf.xlu0 }
  0xdb   : > { %1783 = vmatmul.msk.f32.gmra.mxu2 %vm443_vm0, %v424_v6  ;;  %1815 = vmatmul.msk.f32.gmra.mxu3 %vm443_vm0, %v424_v6 }
  0xe2   : > { %v425_v7 = vpop.trf.xlu0 }
  0xe3   : > { %1784 = vmatmul.msk.f32.gmra.mxu2 %vm443_vm0, %v425_v7  ;;  %1816 = vmatmul.msk.f32.gmra.mxu3 %vm443_vm0, %v425_v7 }
  0xea   : > { %v426_v8 = vpop.trf.xlu0 }
  0xeb   : > { %1785 = vmatmul.msk.f32.gmra.mxu2 %vm443_vm0, %v426_v8  ;;  %1817 = vmatmul.msk.f32.gmra.mxu3 %vm443_vm0, %v426_v8 }
  0xf2   : > { %v427_v9 = vpop.trf.xlu0 }
  0xf3   : > { %1786 = vmatmul.msk.f32.gmra.mxu2 %vm443_vm0, %v427_v9  ;;  %1818 = vmatmul.msk.f32.gmra.mxu3 %vm443_vm0, %v427_v9 }
  0xfa   : > { %v428_v10 = vpop.trf.xlu0 }
  0xfb   : > { %1787 = vmatmul.msk.f32.gmra.mxu2 %vm443_vm0, %v428_v10  ;;  %1819 = vmatmul.msk.f32.gmra.mxu3 %vm443_vm0, %v428_v10  ;;  %v836_v10 = vld [vmem:[%s2933_s2] sm:$0xf] }
 0x102   : > { %v429_v11 = vpop.trf.xlu0 }
 0x103   : > { %1788 = vmatmul.msk.f32.gmra.mxu2 %vm443_vm0, %v429_v11  ;;  %1820 = vmatmul.msk.f32.gmra.mxu3 %vm443_vm0, %v429_v11 }
 0x10a   : > { %v430_v12 = vpop.trf.xlu0 }
 0x10b   : > { %1789 = vmatmul.msk.f32.gmra.mxu2 %vm443_vm0, %v430_v12  ;;  %1821 = vmatmul.msk.f32.gmra.mxu3 %vm443_vm0, %v430_v12 }
 0x112   : > { %v431_v13 = vpop.trf.xlu0 }
 0x113   : > { %1790 = vmatmul.msk.f32.gmra.mxu2 %vm443_vm0, %v431_v13  ;;  %1822 = vmatmul.msk.f32.gmra.mxu3 %vm443_vm0, %v431_v13 }
 0x11a   : > { %v432_v14 = vpop.trf.xlu0 }
 0x11b   : > { %1791 = vmatmul.msk.f32.gmra.mxu2 %vm443_vm0, %v432_v14  ;;  %1823 = vmatmul.msk.f32.gmra.mxu3 %vm443_vm0, %v432_v14 }
 0x122   : > { %v433_v15 = vpop.trf.xlu0 }
 0x123   : > { %1792 = vmatmul.msk.f32.gmra.mxu2 %vm443_vm0, %v433_v15  ;;  %1824 = vmatmul.msk.f32.gmra.mxu3 %vm443_vm0, %v433_v15 }
 0x12a   : > { %v434_v16 = vpop.trf.xlu0 }
 0x12b   : > { %1793 = vmatmul.msk.f32.gmra.mxu2 %vm443_vm0, %v434_v16  ;;  %1825 = vmatmul.msk.f32.gmra.mxu3 %vm443_vm0, %v434_v16 }
 0x132   : > { %v435_v17 = vpop.trf.xlu0 }
 0x133   : > { %1794 = vmatmul.msk.f32.gmra.mxu2 %vm443_vm0, %v435_v17  ;;  %1826 = vmatmul.msk.f32.gmra.mxu3 %vm443_vm0, %v435_v17  ;;  %v2181_v17 = vmov 0  }
 0x134   : > { %1985 = vset.pattern.permute.xlu1 %v2181_v17  ;;  %1986 = vset.pattern.permute.xlu0 %v2181_v17 }
 0x13a   : > { %v436_v18 = vpop.trf.xlu0 }
 0x13b   : > { %1795 = vmatmul.msk.f32.gmra.mxu2 %vm443_vm0, %v436_v18  ;;  %1827 = vmatmul.msk.f32.gmra.mxu3 %vm443_vm0, %v436_v18 }
 0x142   : > { %v437_v19 = vpop.trf.xlu0 }
 0x143   : > { %1796 = vmatmul.msk.f32.gmra.mxu2 %vm443_vm0, %v437_v19  ;;  %1828 = vmatmul.msk.f32.gmra.mxu3 %vm443_vm0, %v437_v19 }
 0x14a   : > { %v390_v20 = vpop.trf.xlu0 }
 0x14b   : > { %1765 = vmatmul.msk.f32.vlgmr.msra.gmra.mxu0 %vm443_vm0, %v390_v20  ;;  %1797 = vmatmul.msk.f32.vlgmr.msra.gmra.mxu1 %vm443_vm0, %v390_v20 }
 0x14c   : > { %1830 = vmatmul.msk.f32.vlgmr.msrb.gmra.mxu3 %vm443_vm0, %v836_v10  ;;  %1829 = vmatmul.msk.f32.vlgmr.msrb.gmra.mxu2 %vm443_vm0, %v836_v10 }
 0x152   : > { %v391_v21 = vpop.trf.xlu0 }
 0x153   : > { %1766 = vmatmul.msk.f32.gmra.mxu0 %vm443_vm0, %v391_v21  ;;  %1798 = vmatmul.msk.f32.gmra.mxu1 %vm443_vm0, %v391_v21 }
 0x156   : > { %v608_v24 = vpop.f32.mrf.mxu2  ;;  %v759_v25 = vpop.f32.mrf.mxu3 }
 0x157   : > { %v609_v26 = vadd.f32 %v2375_v22, %v608_v24  ;;  %v760_v27 = vadd.f32 %v2380_v23, %v759_v25  ;;  %v837_v24 = vld [vmem:[%s2936_s5] sm:$0xf] }
 0x158   : > { %840 = vperm.xlu1 %1985, %v837_v24  }
 0x159   : > { %671 = vst.msk [vmem:[#allocation2 + $0x88] sm:$0xff] %vm653_vm1, %v609_v26 }
 0x15a   : > { %821 = vst.msk [vmem:[#allocation4 + $0x88] sm:$0xff] %vm443_vm0, %v760_v27  ;;  %v392_v28 = vpop.trf.xlu0 }
 0x15b   : > { %1767 = vmatmul.msk.f32.gmra.mxu0 %vm443_vm0, %v392_v28  ;;  %1799 = vmatmul.msk.f32.gmra.mxu1 %vm443_vm0, %v392_v28 }
 0x15e   : > { %v611_v29 = vpop.f32.mrf.mxu2  ;;  %v762_v30 = vpop.f32.mrf.mxu3 }
 0x15f   : > { %v612_v31 = vadd.f32 %v2375_v22, %v611_v29  ;;  %v763_v32 = vadd.f32 %v2380_v23, %v762_v30 }
 0x161   : > { %672 = vst.msk [vmem:[#allocation2 + $0x90] sm:$0xff] %vm653_vm1, %v612_v31 }
 0x162   : > { %822 = vst.msk [vmem:[#allocation4 + $0x90] sm:$0xff] %vm443_vm0, %v763_v32  ;;  %v393_v33 = vpop.trf.xlu0 }
 0x163   : > { %1768 = vmatmul.msk.f32.gmra.mxu0 %vm443_vm0, %v393_v33  ;;  %1800 = vmatmul.msk.f32.gmra.mxu1 %vm443_vm0, %v393_v33 }
 0x166   : > { %v614_v34 = vpop.f32.mrf.mxu2  ;;  %v765_v35 = vpop.f32.mrf.mxu3 }
 0x167   : > { %v615_v36 = vadd.f32 %v2375_v22, %v614_v34  ;;  %v766_v37 = vadd.f32 %v2380_v23, %v765_v35 }
 0x169   : > { %673 = vst.msk [vmem:[#allocation2 + $0x98] sm:$0xff] %vm653_vm1, %v615_v36 }
 0x16a   : > { %823 = vst.msk [vmem:[#allocation4 + $0x98] sm:$0xff] %vm443_vm0, %v766_v37  ;;  %v394_v38 = vpop.trf.xlu0 }
 0x16b   : > { %1769 = vmatmul.msk.f32.gmra.mxu0 %vm443_vm0, %v394_v38  ;;  %1801 = vmatmul.msk.f32.gmra.mxu1 %vm443_vm0, %v394_v38 }
 0x16e   : > { %v617_v39 = vpop.f32.mrf.mxu2  ;;  %v768_v40 = vpop.f32.mrf.mxu3 }
 0x16f   : > { %v618_v41 = vadd.f32 %v2375_v22, %v617_v39  ;;  %v769_v42 = vadd.f32 %v2380_v23, %v768_v40 }
 0x171   : > { %674 = vst.msk [vmem:[#allocation2 + $0xa0] sm:$0xff] %vm653_vm1, %v618_v41 }
 0x172   : > { %824 = vst.msk [vmem:[#allocation4 + $0xa0] sm:$0xff] %vm443_vm0, %v769_v42  ;;  %v395_v43 = vpop.trf.xlu0 }
 0x173   : > { %1770 = vmatmul.msk.f32.gmra.mxu0 %vm443_vm0, %v395_v43  ;;  %1802 = vmatmul.msk.f32.gmra.mxu1 %vm443_vm0, %v395_v43 }
 0x176   : > { %v620_v44 = vpop.f32.mrf.mxu2  ;;  %v771_v45 = vpop.f32.mrf.mxu3 }
 0x177   : > { %v621_v46 = vadd.f32 %v2375_v22, %v620_v44  ;;  %v772_v47 = vadd.f32 %v2380_v23, %v771_v45 }
 0x179   : > { %675 = vst.msk [vmem:[#allocation2 + $0xa8] sm:$0xff] %vm653_vm1, %v621_v46 }
 0x17a   : > { %825 = vst.msk [vmem:[#allocation4 + $0xa8] sm:$0xff] %vm443_vm0, %v772_v47  ;;  %v396_v48 = vpop.trf.xlu0 }
 0x17b   : > { %1771 = vmatmul.msk.f32.gmra.mxu0 %vm443_vm0, %v396_v48  ;;  %1803 = vmatmul.msk.f32.gmra.mxu1 %vm443_vm0, %v396_v48 }
 0x17e   : > { %v623_v49 = vpop.f32.mrf.mxu2  ;;  %v774_v50 = vpop.f32.mrf.mxu3 }
 0x17f   : > { %v624_v51 = vadd.f32 %v2375_v22, %v623_v49  ;;  %v775_v52 = vadd.f32 %v2380_v23, %v774_v50 }
 0x181   : > { %676 = vst.msk [vmem:[#allocation2 + $0xb0] sm:$0xff] %vm653_vm1, %v624_v51 }
 0x182   : > { %826 = vst.msk [vmem:[#allocation4 + $0xb0] sm:$0xff] %vm443_vm0, %v775_v52  ;;  %v397_v53 = vpop.trf.xlu0 }
 0x183   : > { %1772 = vmatmul.msk.f32.gmra.mxu0 %vm443_vm0, %v397_v53  ;;  %1804 = vmatmul.msk.f32.gmra.mxu1 %vm443_vm0, %v397_v53 }
 0x186   : > { %v626_v54 = vpop.f32.mrf.mxu2  ;;  %v777_v55 = vpop.f32.mrf.mxu3 }
 0x187   : > { %v627_v56 = vadd.f32 %v2375_v22, %v626_v54  ;;  %v778_v57 = vadd.f32 %v2380_v23, %v777_v55 }
 0x189   : > { %677 = vst.msk [vmem:[#allocation2 + $0xb8] sm:$0xff] %vm653_vm1, %v627_v56 }
 0x18a   : > { %827 = vst.msk [vmem:[#allocation4 + $0xb8] sm:$0xff] %vm443_vm0, %v778_v57  ;;  %v398_v58 = vpop.trf.xlu0 }
 0x18b   : > { %1773 = vmatmul.msk.f32.gmra.mxu0 %vm443_vm0, %v398_v58  ;;  %1805 = vmatmul.msk.f32.gmra.mxu1 %vm443_vm0, %v398_v58 }
 0x18e   : > { %v629_v59 = vpop.f32.mrf.mxu2  ;;  %v780_v60 = vpop.f32.mrf.mxu3 }
 0x18f   : > { %v630_v61 = vadd.f32 %v2375_v22, %v629_v59  ;;  %v781_v62 = vadd.f32 %v2380_v23, %v780_v60 }
 0x191   : > { %678 = vst.msk [vmem:[#allocation2 + $0xc0] sm:$0xff] %vm653_vm1, %v630_v61 }
 0x192   : > { %828 = vst.msk [vmem:[#allocation4 + $0xc0] sm:$0xff] %vm443_vm0, %v781_v62  ;;  %v399_v63 = vpop.trf.xlu0 }
 0x193   : > { %1774 = vmatmul.msk.f32.gmra.mxu0 %vm443_vm0, %v399_v63  ;;  %1806 = vmatmul.msk.f32.gmra.mxu1 %vm443_vm0, %v399_v63 }
 0x196   : > { %v632_v0 = vpop.f32.mrf.mxu2  ;;  %v783_v1 = vpop.f32.mrf.mxu3 }
 0x197   : > { %v633_v2 = vadd.f32 %v2375_v22, %v632_v0  ;;  %v784_v3 = vadd.f32 %v2380_v23, %v783_v1 }
 0x199   : > { %679 = vst.msk [vmem:[#allocation2 + $0xc8] sm:$0xff] %vm653_vm1, %v633_v2 }
 0x19a   : > { %829 = vst.msk [vmem:[#allocation4 + $0xc8] sm:$0xff] %vm443_vm0, %v784_v3  ;;  %v400_v5 = vpop.trf.xlu0 }
 0x19b   : > { %1775 = vmatmul.msk.f32.gmra.mxu0 %vm443_vm0, %v400_v5  ;;  %1807 = vmatmul.msk.f32.gmra.mxu1 %vm443_vm0, %v400_v5 }
 0x19e   : > { %v635_v6 = vpop.f32.mrf.mxu2  ;;  %v786_v7 = vpop.f32.mrf.mxu3 }
 0x19f   : > { %v636_v8 = vadd.f32 %v2375_v22, %v635_v6  ;;  %v787_v9 = vadd.f32 %v2380_v23, %v786_v7 }
 0x1a1   : > { %680 = vst.msk [vmem:[#allocation2 + $0xd0] sm:$0xff] %vm653_vm1, %v636_v8 }
 0x1a2   : > { %830 = vst.msk [vmem:[#allocation4 + $0xd0] sm:$0xff] %vm443_vm0, %v787_v9  ;;  %v401_v11 = vpop.trf.xlu0 }
 0x1a3   : > { %1776 = vmatmul.msk.f32.gmra.mxu0 %vm443_vm0, %v401_v11  ;;  %1808 = vmatmul.msk.f32.gmra.mxu1 %vm443_vm0, %v401_v11 }
 0x1a6   : > { %v638_v12 = vpop.f32.mrf.mxu2  ;;  %v789_v13 = vpop.f32.mrf.mxu3 }
 0x1a7   : > { %v639_v14 = vadd.f32 %v2375_v22, %v638_v12  ;;  %v790_v15 = vadd.f32 %v2380_v23, %v789_v13 }
 0x1a9   : > { %681 = vst.msk [vmem:[#allocation2 + $0xd8] sm:$0xff] %vm653_vm1, %v639_v14 }
 0x1aa   : > { %831 = vst.msk [vmem:[#allocation4 + $0xd8] sm:$0xff] %vm443_vm0, %v790_v15  ;;  %v402_v16 = vpop.trf.xlu0 }
 0x1ab   : > { %1777 = vmatmul.msk.f32.gmra.mxu0 %vm443_vm0, %v402_v16  ;;  %1809 = vmatmul.msk.f32.gmra.mxu1 %vm443_vm0, %v402_v16 }
 0x1ae   : > { %v641_v18 = vpop.f32.mrf.mxu2  ;;  %v792_v19 = vpop.f32.mrf.mxu3 }
 0x1af   : > { %v642_v20 = vadd.f32 %v2375_v22, %v641_v18  ;;  %v793_v21 = vadd.f32 %v2380_v23, %v792_v19 }
 0x1b1   : > { %682 = vst.msk [vmem:[#allocation2 + $0xe0] sm:$0xff] %vm653_vm1, %v642_v20 }
 0x1b2   : > { %832 = vst.msk [vmem:[#allocation4 + $0xe0] sm:$0xff] %vm443_vm0, %v793_v21  ;;  %v403_v25 = vpop.trf.xlu0 }
 0x1b3   : > { %1778 = vmatmul.msk.f32.gmra.mxu0 %vm443_vm0, %v403_v25  ;;  %1810 = vmatmul.msk.f32.gmra.mxu1 %vm443_vm0, %v403_v25 }
 0x1b6   : > { %v644_v26 = vpop.f32.mrf.mxu2  ;;  %v795_v27 = vpop.f32.mrf.mxu3 }
 0x1b7   : > { %v645_v28 = vadd.f32 %v2375_v22, %v644_v26  ;;  %v796_v29 = vadd.f32 %v2380_v23, %v795_v27 }
 0x1b9   : > { %683 = vst.msk [vmem:[#allocation2 + $0xe8] sm:$0xff] %vm653_vm1, %v645_v28 }
 0x1ba   : > { %833 = vst.msk [vmem:[#allocation4 + $0xe8] sm:$0xff] %vm443_vm0, %v796_v29  ;;  %v404_v30 = vpop.trf.xlu0 }
 0x1bb   : > { %1779 = vmatmul.msk.f32.gmra.mxu0 %vm443_vm0, %v404_v30  ;;  %1811 = vmatmul.msk.f32.gmra.mxu1 %vm443_vm0, %v404_v30 }
 0x1be   : > { %v647_v31 = vpop.f32.mrf.mxu2  ;;  %v798_v32 = vpop.f32.mrf.mxu3 }
 0x1bf   : > { %v648_v33 = vadd.f32 %v2375_v22, %v647_v31  ;;  %v799_v34 = vadd.f32 %v2380_v23, %v798_v32 }
 0x1c1   : > { %684 = vst.msk [vmem:[#allocation2 + $0xf0] sm:$0xff] %vm653_vm1, %v648_v33 }
 0x1c2   : > { %834 = vst.msk [vmem:[#allocation4 + $0xf0] sm:$0xff] %vm443_vm0, %v799_v34  ;;  %v405_v35 = vpop.trf.xlu0 }
 0x1c3   : > { %1780 = vmatmul.msk.f32.gmra.mxu0 %vm443_vm0, %v405_v35  ;;  %1812 = vmatmul.msk.f32.gmra.mxu1 %vm443_vm0, %v405_v35 }
 0x1c6   : > { %v650_v36 = vpop.f32.mrf.mxu2  ;;  %v801_v37 = vpop.f32.mrf.mxu3 }
 0x1c7   : > { %v651_v38 = vadd.f32 %v2375_v22, %v650_v36  ;;  %v802_v39 = vadd.f32 %v2380_v23, %v801_v37 }
 0x1c8   : > { %v557_v40 = vpop.f32.mrf.mxu0  ;;  %v708_v41 = vpop.f32.mrf.mxu1 }
 0x1c9   : > { %685 = vst.msk [vmem:[#allocation2 + $0xf8] sm:$0xff] %vm653_vm1, %v651_v38  ;;  %v558_v42 = vadd.f32 %v2375_v22, %v557_v40  ;;  %v709_v43 = vadd.f32 %v2380_v23, %v708_v41 }
 0x1ca   : > { %835 = vst.msk [vmem:[#allocation4 + $0xf8] sm:$0xff] %vm443_vm0, %v802_v39  ;;  %v841_v26 = vpop.permute.xlu1 %840 }
 0x1cb   : > { %654 = vst.msk [vmem:[#allocation2] sm:$0xff] %vm653_vm1, %v558_v42  ;;  %1781 = vmatmul.msk.f32.gmra.mxu0 %vm443_vm0, %v2336_v4  ;;  %1813 = vmatmul.msk.f32.gmra.mxu1 %vm443_vm0, %v2336_v4 }
 0x1cc   : > { %804 = vst.msk [vmem:[#allocation4] sm:$0xff] %vm443_vm0, %v709_v43 }
 0x1cf   : > { %v883_v27 = vpop.f32.mrf.mxu3  ;;  %v863_v29 = vpop.f32.mrf.mxu2 }
 0x1d0   : > { %v560_v44 = vpop.f32.mrf.mxu0  ;;  %v711_v45 = vpop.f32.mrf.mxu1  ;;  %v884_v28 = vadd.f32 %v883_v27, %v841_v26  ;;  %v864_v30 = vadd.f32 %v863_v29, %v841_v26 }
 0x1d1   : > { %v561_v46 = vadd.f32 %v2375_v22, %v560_v44  ;;  %v712_v47 = vadd.f32 %v2380_v23, %v711_v45 }
 0x1d2   : > { %v888_v31 = vrot.slane %v884_v28, 4 }
 0x1d3   : > { %655 = vst.msk [vmem:[#allocation2 + $0x8] sm:$0xff] %vm653_vm1, %v561_v46 }
 0x1d4   : > { %805 = vst.msk [vmem:[#allocation4 + $0x8] sm:$0xff] %vm443_vm0, %v712_v47  ;;  %v890_v36 = vsel %vm889_vm2, %v864_v30, %v888_v31 }
 0x1d5   : > { %892 = vst [vmem:[#allocation3] sm:$0xff] %v890_v36 }
 0x1d8   : > { %v563_v48 = vpop.f32.mrf.mxu0  ;;  %v714_v49 = vpop.f32.mrf.mxu1 }
 0x1d9   : > { %v564_v50 = vadd.f32 %v2375_v22, %v563_v48  ;;  %v715_v51 = vadd.f32 %v2380_v23, %v714_v49 }
 0x1db   : > { %656 = vst.msk [vmem:[#allocation2 + $0x10] sm:$0xff] %vm653_vm1, %v564_v50 }
 0x1dc   : > { %806 = vst.msk [vmem:[#allocation4 + $0x10] sm:$0xff] %vm443_vm0, %v715_v51 }
 0x1e0   : > { %v566_v4 = vpop.f32.mrf.mxu0  ;;  %v717_v52 = vpop.f32.mrf.mxu1 }
 0x1e1   : > { %v567_v53 = vadd.f32 %v2375_v22, %v566_v4  ;;  %v718_v54 = vadd.f32 %v2380_v23, %v717_v52 }
 0x1e3   : > { %657 = vst.msk [vmem:[#allocation2 + $0x18] sm:$0xff] %vm653_vm1, %v567_v53 }
 0x1e4   : > { %807 = vst.msk [vmem:[#allocation4 + $0x18] sm:$0xff] %vm443_vm0, %v718_v54 }
 0x1e8   : > { %v569_v55 = vpop.f32.mrf.mxu0  ;;  %v720_v56 = vpop.f32.mrf.mxu1 }
 0x1e9   : > { %v570_v57 = vadd.f32 %v2375_v22, %v569_v55  ;;  %v721_v58 = vadd.f32 %v2380_v23, %v720_v56 }
 0x1eb   : > { %658 = vst.msk [vmem:[#allocation2 + $0x20] sm:$0xff] %vm653_vm1, %v570_v57 }
 0x1ec   : > { %808 = vst.msk [vmem:[#allocation4 + $0x20] sm:$0xff] %vm443_vm0, %v721_v58 }
 0x1f0   : > { %v572_v59 = vpop.f32.mrf.mxu0  ;;  %v723_v60 = vpop.f32.mrf.mxu1 }
 0x1f1   : > { %v573_v61 = vadd.f32 %v2375_v22, %v572_v59  ;;  %v724_v62 = vadd.f32 %v2380_v23, %v723_v60 }
 0x1f3   : > { %659 = vst.msk [vmem:[#allocation2 + $0x28] sm:$0xff] %vm653_vm1, %v573_v61 }
 0x1f4   : > { %809 = vst.msk [vmem:[#allocation4 + $0x28] sm:$0xff] %vm443_vm0, %v724_v62 }
 0x1f8   : > { %v575_v63 = vpop.f32.mrf.mxu0  ;;  %v726_v0 = vpop.f32.mrf.mxu1 }
 0x1f9   : > { %v576_v1 = vadd.f32 %v2375_v22, %v575_v63  ;;  %v727_v2 = vadd.f32 %v2380_v23, %v726_v0 }
 0x1fb   : > { %660 = vst.msk [vmem:[#allocation2 + $0x30] sm:$0xff] %vm653_vm1, %v576_v1 }
 0x1fc   : > { %810 = vst.msk [vmem:[#allocation4 + $0x30] sm:$0xff] %vm443_vm0, %v727_v2 }
 0x200   : > { %v578_v3 = vpop.f32.mrf.mxu0  ;;  %v729_v5 = vpop.f32.mrf.mxu1 }
 0x201   : > { %v579_v6 = vadd.f32 %v2375_v22, %v578_v3  ;;  %v730_v7 = vadd.f32 %v2380_v23, %v729_v5 }
 0x203   : > { %661 = vst.msk [vmem:[#allocation2 + $0x38] sm:$0xff] %vm653_vm1, %v579_v6 }
 0x204   : > { %811 = vst.msk [vmem:[#allocation4 + $0x38] sm:$0xff] %vm443_vm0, %v730_v7 }
 0x208   : > { %v581_v8 = vpop.f32.mrf.mxu0  ;;  %v732_v9 = vpop.f32.mrf.mxu1 }
 0x209   : > { %v582_v10 = vadd.f32 %v2375_v22, %v581_v8  ;;  %v733_v11 = vadd.f32 %v2380_v23, %v732_v9 }
 0x20b   : > { %662 = vst.msk [vmem:[#allocation2 + $0x40] sm:$0xff] %vm653_vm1, %v582_v10 }
 0x20c   : > { %812 = vst.msk [vmem:[#allocation4 + $0x40] sm:$0xff] %vm443_vm0, %v733_v11 }
 0x210   : > { %v584_v12 = vpop.f32.mrf.mxu0  ;;  %v735_v13 = vpop.f32.mrf.mxu1 }
 0x211   : > { %v585_v14 = vadd.f32 %v2375_v22, %v584_v12  ;;  %v736_v15 = vadd.f32 %v2380_v23, %v735_v13 }
 0x213   : > { %663 = vst.msk [vmem:[#allocation2 + $0x48] sm:$0xff] %vm653_vm1, %v585_v14 }
 0x214   : > { %813 = vst.msk [vmem:[#allocation4 + $0x48] sm:$0xff] %vm443_vm0, %v736_v15 }
 0x218   : > { %v587_v16 = vpop.f32.mrf.mxu0  ;;  %v738_v17 = vpop.f32.mrf.mxu1 }
 0x219   : > { %v588_v18 = vadd.f32 %v2375_v22, %v587_v16  ;;  %v739_v19 = vadd.f32 %v2380_v23, %v738_v17 }
 0x21b   : > { %664 = vst.msk [vmem:[#allocation2 + $0x50] sm:$0xff] %vm653_vm1, %v588_v18 }
 0x21c   : > { %814 = vst.msk [vmem:[#allocation4 + $0x50] sm:$0xff] %vm443_vm0, %v739_v19 }
 0x220   : > { %v590_v20 = vpop.f32.mrf.mxu0  ;;  %v741_v21 = vpop.f32.mrf.mxu1 }
 0x221   : > { %v591_v24 = vadd.f32 %v2375_v22, %v590_v20  ;;  %v742_v25 = vadd.f32 %v2380_v23, %v741_v21 }
 0x223   : > { %665 = vst.msk [vmem:[#allocation2 + $0x58] sm:$0xff] %vm653_vm1, %v591_v24 }
 0x224   : > { %815 = vst.msk [vmem:[#allocation4 + $0x58] sm:$0xff] %vm443_vm0, %v742_v25 }
 0x228   : > { %v593_v32 = vpop.f32.mrf.mxu0  ;;  %v744_v33 = vpop.f32.mrf.mxu1 }
 0x229   : > { %v594_v34 = vadd.f32 %v2375_v22, %v593_v32  ;;  %v745_v35 = vadd.f32 %v2380_v23, %v744_v33 }
 0x22b   : > { %666 = vst.msk [vmem:[#allocation2 + $0x60] sm:$0xff] %vm653_vm1, %v594_v34 }
 0x22c   : > { %816 = vst.msk [vmem:[#allocation4 + $0x60] sm:$0xff] %vm443_vm0, %v745_v35 }
 0x230   : > { %v596_v37 = vpop.f32.mrf.mxu0  ;;  %v747_v38 = vpop.f32.mrf.mxu1 }
 0x231   : > { %v597_v39 = vadd.f32 %v2375_v22, %v596_v37  ;;  %v748_v40 = vadd.f32 %v2380_v23, %v747_v38 }
 0x233   : > { %667 = vst.msk [vmem:[#allocation2 + $0x68] sm:$0xff] %vm653_vm1, %v597_v39 }
 0x234   : > { %817 = vst.msk [vmem:[#allocation4 + $0x68] sm:$0xff] %vm443_vm0, %v748_v40 }
 0x238   : > { %v599_v41 = vpop.f32.mrf.mxu0  ;;  %v750_v42 = vpop.f32.mrf.mxu1 }
 0x239   : > { %v600_v43 = vadd.f32 %v2375_v22, %v599_v41  ;;  %v751_v44 = vadd.f32 %v2380_v23, %v750_v42 }
 0x23b   : > { %668 = vst.msk [vmem:[#allocation2 + $0x70] sm:$0xff] %vm653_vm1, %v600_v43 }
 0x23c   : > { %818 = vst.msk [vmem:[#allocation4 + $0x70] sm:$0xff] %vm443_vm0, %v751_v44 }
 0x240   : > { %v602_v45 = vpop.f32.mrf.mxu0  ;;  %v753_v46 = vpop.f32.mrf.mxu1 }
 0x241   : > { %v603_v47 = vadd.f32 %v2375_v22, %v602_v45  ;;  %v754_v48 = vadd.f32 %v2380_v23, %v753_v46 }
 0x243   : > { %669 = vst.msk [vmem:[#allocation2 + $0x78] sm:$0xff] %vm653_vm1, %v603_v47 }
 0x244   : > { %819 = vst.msk [vmem:[#allocation4 + $0x78] sm:$0xff] %vm443_vm0, %v754_v48 }
 0x248   : > { %v605_v49 = vpop.f32.mrf.mxu0  ;;  %v756_v50 = vpop.f32.mrf.mxu1 }
 0x249   : > { %v606_v51 = vadd.f32 %v2375_v22, %v605_v49  ;;  %v757_v4 = vadd.f32 %v2380_v23, %v756_v50 }
 0x24b   : > { %670 = vst.msk [vmem:[#allocation2 + $0x80] sm:$0xff] %vm653_vm1, %v606_v51 }
 0x24c   : > { %820 = vst.msk [vmem:[#allocation4 + $0x80] sm:$0xff] %vm443_vm0, %v757_v4 }
 0x24d PF: > { %v911_v52 = vld [vmem:[#allocation3] sm:$0xff]  ;;  %s2946_s19 = sshll.u32 %s2163_s14, 7  ;;  %vm965_vm3 = vcmask 1043456   ;;  %vm916_vm4 = vcmask 31744   ;;  %s1875_s7 = sshll.u32 %s2163_s14, 5 }
 0x24e   : > { %913 = vst [vmem:[#allocation1] ss:$2 sm:$0xff] %v911_v52  ;;  %s2553_s21 = scalar_lea.vmem [#allocation2], %s2946_s19  ;;  %s1870_s16 = sshll.u32 %s2167_s15, 6 }
 0x24f   : > { %s1632_s17 = sadd.s32 %s1875_s7, %s1870_s16  ;;  %s1635_s27 = sshll.u32 %s2325_s13, 4  ;;  %s1636_s27 = int_to_ptr.vmem [resolvable:$true] %s1635_s27 }
 0x250   : > { %s1871_s20 = sshll.u32 %s1632_s17, 2  ;;  %s2105_s17 = scalar_lea.hbm %s2940_s9, 512 }
 0x251   : > { %s1634_s25 = scalar_lea.hbm %s2940_s9, %s1871_s20 }
 0x252   : > { %v895_v22 = vld [vmem:[%s2553_s21] sm:$0xff]  ;;  %v896_v54 = vld [vmem:[%s2553_s21 + $0x8] sm:$0xff]  ;;  %v897_v55 = vld [vmem:[%s2553_s21 + $0x10] sm:$0xff]  ;;  %s1637_s10 = sshll.u32 %s1634_s25, 4  ;;  %s1638_s10 = int_to_ptr.hbm [resolvable:$true] %s1637_s10 }
 0x253   : > { %v898_v56 = vld [vmem:[%s2553_s21 + $0x18] sm:$0xff]  ;;  %v899_v57 = vld [vmem:[%s2553_s21 + $0x20] sm:$0xff]  ;;  %v900_v58 = vld [vmem:[%s2553_s21 + $0x28] sm:$0xff]  ;;  %s2099_s19 = sshra.s32 %s1638_s10, 4  ;;  %s2100_s19 = int_to_ptr.hbm [resolvable:$true] %s2099_s19 }
 0x254   : > { %v901_v59 = vld [vmem:[%s2553_s21 + $0x30] sm:$0xff]  ;;  %v902_v60 = vld [vmem:[%s2553_s21 + $0x38] sm:$0xff]  ;;  %v903_v61 = vld [vmem:[%s2553_s21 + $0x40] sm:$0xff]  ;;  %s2101_s15 = scalar_lea.hbm %s2100_s19, 128  ;;  %p2106_p5 = scmp.lt.s32.totalorder %s2100_s19, %s2940_s9 }
 0x255   : > { %v914_v23 = vld.sshfl [vmem:[#allocation1] sm:$0xff pattern:$0x75316420]  ;;  %v915_v53 = vld.sshfl [vmem:[#allocation1 + $0x8] sm:$0xff pattern:$0x75316420]  ;;  %p2102_p1 = scmp.ne.s32.totalorder %s2100_s19, %s2101_s15  ;;  %p2107_p6 = scmp.lt.s32.totalorder %s2105_s17, %s2101_s15 }
 0x256   : > { %1832 = vmatpush.msk.msra.mxu0 %vm965_vm3, %v914_v23  ;;  %1849 = vmatpush.msk.msra.mxu1 %vm965_vm3, %v915_v53  ;;  %v904_v62 = vld [vmem:[%s2553_s21 + $0x48] sm:$0xff]  ;;  %v905_v63 = vld [vmem:[%s2553_s21 + $0x50] sm:$0xff]  ;;  %v906_v2 = vld [vmem:[%s2553_s21 + $0x58] sm:$0xff] }
 0x257   : > { %1833 = vmatmul.msk.f32.vlgmr.msra.gmra.mxu0 %vm916_vm4, %v895_v22  ;;  %1850 = vmatmul.msk.f32.vlgmr.msra.gmra.mxu1 %vm916_vm4, %v895_v22  ;;  %v907_v8 = vld [vmem:[%s2553_s21 + $0x60] sm:$0xff]  ;;  %v908_v14 = vld [vmem:[%s2553_s21 + $0x68] sm:$0xff]  ;;  %v909_v20 = vld [vmem:[%s2553_s21 + $0x70] sm:$0xff]  ;;  %p2103_p2 = pnand %p2102_p1, %p2288_p3  ;;  %p2108_p7 = por %p2107_p6, %p2106_p5 }
 0x258   : > { %v910_v28 = vld [vmem:[%s2553_s21 + $0x78] sm:$0xff]  ;;  %s1617_s21 = scalar_lea.sflag [#allocation7], %s351_s29 }
 0x259   : > { %p2104_p4 = pneg %p2103_p2 }
 0x25b   : > { %p2109_p9 = pnand %p2108_p7, %p2104_p4 }
 0x25f   : > { %1834 = vmatmul.msk.f32.gmra.mxu0 %vm916_vm4, %v896_v54  ;;  %1851 = vmatmul.msk.f32.gmra.mxu1 %vm916_vm4, %v896_v54 }
 0x267   : > { %1835 = vmatmul.msk.f32.gmra.mxu0 %vm916_vm4, %v897_v55  ;;  %1852 = vmatmul.msk.f32.gmra.mxu1 %vm916_vm4, %v897_v55 }
 0x26f   : > { %1836 = vmatmul.msk.f32.gmra.mxu0 %vm916_vm4, %v898_v56  ;;  %1853 = vmatmul.msk.f32.gmra.mxu1 %vm916_vm4, %v898_v56 }
 0x277   : > { %1837 = vmatmul.msk.f32.gmra.mxu0 %vm916_vm4, %v899_v57  ;;  %1854 = vmatmul.msk.f32.gmra.mxu1 %vm916_vm4, %v899_v57 }
 0x27f   : > { %1838 = vmatmul.msk.f32.gmra.mxu0 %vm916_vm4, %v900_v58  ;;  %1855 = vmatmul.msk.f32.gmra.mxu1 %vm916_vm4, %v900_v58 }
 0x287   : > { %1839 = vmatmul.msk.f32.gmra.mxu0 %vm916_vm4, %v901_v59  ;;  %1856 = vmatmul.msk.f32.gmra.mxu1 %vm916_vm4, %v901_v59 }
 0x28f   : > { %1840 = vmatmul.msk.f32.gmra.mxu0 %vm916_vm4, %v902_v60  ;;  %1857 = vmatmul.msk.f32.gmra.mxu1 %vm916_vm4, %v902_v60 }
 0x297   : > { %1841 = vmatmul.msk.f32.gmra.mxu0 %vm916_vm4, %v903_v61  ;;  %1858 = vmatmul.msk.f32.gmra.mxu1 %vm916_vm4, %v903_v61 }
 0x29f   : > { %1842 = vmatmul.msk.f32.gmra.mxu0 %vm916_vm4, %v904_v62  ;;  %1859 = vmatmul.msk.f32.gmra.mxu1 %vm916_vm4, %v904_v62 }
 0x2a7   : > { %1843 = vmatmul.msk.f32.gmra.mxu0 %vm916_vm4, %v905_v63  ;;  %1860 = vmatmul.msk.f32.gmra.mxu1 %vm916_vm4, %v905_v63 }
 0x2af   : > { %1844 = vmatmul.msk.f32.gmra.mxu0 %vm916_vm4, %v906_v2  ;;  %1861 = vmatmul.msk.f32.gmra.mxu1 %vm916_vm4, %v906_v2 }
 0x2b7   : > { %1845 = vmatmul.msk.f32.gmra.mxu0 %vm916_vm4, %v907_v8  ;;  %1862 = vmatmul.msk.f32.gmra.mxu1 %vm916_vm4, %v907_v8 }
 0x2bf   : > { %1846 = vmatmul.msk.f32.gmra.mxu0 %vm916_vm4, %v908_v14  ;;  %1863 = vmatmul.msk.f32.gmra.mxu1 %vm916_vm4, %v908_v14 }
 0x2c7   : > { %1847 = vmatmul.msk.f32.gmra.mxu0 %vm916_vm4, %v909_v20  ;;  %1864 = vmatmul.msk.f32.gmra.mxu1 %vm916_vm4, %v909_v20 }
 0x2cf   : > { %1848 = vmatmul.msk.f32.gmra.mxu0 %vm916_vm4, %v910_v28  ;;  %1865 = vmatmul.msk.f32.gmra.mxu1 %vm916_vm4, %v910_v28 }
 0x2d4   : > { %v2588_v0 = vpop.f32.mrf.mxu0  ;;  %v2590_v1 = vpop.f32.mrf.mxu1 }
 0x2d5   : > { %v2687_v20 = vmul.f32 0.5, %v2590_v1 }
 0x2dc   : > { %v990_v3 = vpop.f32.mrf.mxu0  ;;  %v1055_v5 = vpop.f32.mrf.mxu1 }
 0x2dd   : > { %v2595_v6 = vmul.f32 0.5, %v990_v3  ;;  %v2597_v7 = vmul.f32 0.5, %v1055_v5 }
 0x2df   : > { %v1135_v9 = vmax.f32 %v2595_v6, %v2597_v7 }
 0x2e1   : > { %1136 = vmax.xlane.f32.xlu0 %v1135_v9 }
 0x2e4   : > { %v993_v10 = vpop.f32.mrf.mxu0  ;;  %v1058_v11 = vpop.f32.mrf.mxu1 }
 0x2e5   : > { %v2604_v12 = vmul.f32 0.5, %v993_v10  ;;  %v2606_v13 = vmul.f32 0.5, %v1058_v11 }
 0x2e7   : > { %v1138_v15 = vmax.f32 %v2604_v12, %v2606_v13 }
 0x2e9   : > { %1139 = vmax.xlane.f32.xlu0 %v1138_v15 }
 0x2ec   : > { %v996_v16 = vpop.f32.mrf.mxu0  ;;  %v1061_v17 = vpop.f32.mrf.mxu1 }
 0x2ed   : > { %v2613_v18 = vmul.f32 0.5, %v996_v16  ;;  %v2615_v19 = vmul.f32 0.5, %v1061_v17 }
 0x2ef   : > { %v1141_v21 = vmax.f32 %v2613_v18, %v2615_v19 }
 0x2f1   : > { %1142 = vmax.xlane.f32.xlu1 %v1141_v21 }
 0x2f4   : > { %v999_v24 = vpop.f32.mrf.mxu0  ;;  %v1064_v25 = vpop.f32.mrf.mxu1 }
 0x2f5   : > { %v2622_v26 = vmul.f32 0.5, %v999_v24  ;;  %v2624_v27 = vmul.f32 0.5, %v1064_v25 }
 0x2f7   : > { %v1144_v29 = vmax.f32 %v2622_v26, %v2624_v27 }
 0x2f9   : > { %1145 = vmax.xlane.f32.xlu1 %v1144_v29 }
 0x2fc   : > { %v1002_v30 = vpop.f32.mrf.mxu0  ;;  %v1067_v31 = vpop.f32.mrf.mxu1 }
 0x2fd   : > { %v2631_v32 = vmul.f32 0.5, %v1002_v30  ;;  %v2633_v33 = vmul.f32 0.5, %v1067_v31 }
 0x2ff   : > { %v1147_v34 = vmax.f32 %v2631_v32, %v2633_v33 }
 0x301   : > { %1148 = vmax.xlane.f32.xlu2 %v1147_v34 }
 0x304   : > { %v1005_v35 = vpop.f32.mrf.mxu0  ;;  %v1070_v36 = vpop.f32.mrf.mxu1 }
 0x305   : > { %v2637_v37 = vmul.f32 0.5, %v1005_v35  ;;  %v2639_v38 = vmul.f32 0.5, %v1070_v36 }
 0x307   : > { %v1150_v39 = vmax.f32 %v2637_v37, %v2639_v38 }
 0x309   : > { %1151 = vmax.xlane.f32.xlu2 %v1150_v39 }
 0x30c   : > { %v1008_v40 = vpop.f32.mrf.mxu0  ;;  %v1073_v41 = vpop.f32.mrf.mxu1 }
 0x30d   : > { %v2643_v42 = vmul.f32 0.5, %v1008_v40  ;;  %v2645_v43 = vmul.f32 0.5, %v1073_v41 }
 0x30f   : > { %v1153_v44 = vmax.f32 %v2643_v42, %v2645_v43 }
 0x311   : > { %1154 = vmax.xlane.f32.xlu0 %v1153_v44 }
 0x314   : > { %v1011_v45 = vpop.f32.mrf.mxu0  ;;  %v1076_v46 = vpop.f32.mrf.mxu1 }
 0x315   : > { %v2649_v47 = vmul.f32 0.5, %v1011_v45  ;;  %v2651_v48 = vmul.f32 0.5, %v1076_v46 }
 0x317   : > { %v1156_v49 = vmax.f32 %v2649_v47, %v2651_v48 }
 0x319   : > { %1157 = vmax.xlane.f32.xlu2 %v1156_v49 }
 0x31c   : > { %v1014_v50 = vpop.f32.mrf.mxu0  ;;  %v1079_v4 = vpop.f32.mrf.mxu1 }
 0x31d   : > { %v2665_v2 = vmul.f32 0.5, %v1014_v50  ;;  %v2667_v3 = vmul.f32 0.5, %v1079_v4  ;;  %v1419_v4 = vld [vmem:[#allocation4 + $0x78] sm:$0xff] }
 0x31e   : > { %1878 = vmatpush.msra.mxu2 %v1419_v4  ;;  %1436 = vmatpush.msrb.mxu0 %v1419_v4 }
 0x31f   : > { %v1159_v11 = vmax.f32 %v2665_v2, %v2667_v3 }
 0x324   : > { %v1017_v57 = vpop.f32.mrf.mxu0  ;;  %v1082_v58 = vpop.f32.mrf.mxu1 }
 0x325   : > { %v2679_v17 = vmul.f32 0.5, %v1017_v57  ;;  %v1417_v57 = vld [vmem:[#allocation4 + $0x68] sm:$0xff] }
 0x32c   : > { %v1085_v14 = vpop.f32.mrf.mxu1 }
 0x32d   : > { %v2703_v36 = vmul.f32 0.5, %v1085_v14  ;;  %v1414_v14 = vld [vmem:[#allocation4 + $0x50] sm:$0xff] }
 0x354   : > { %v1137_v51 = vpop.xlane.xlu0 %1136 }
 0x355   : > { %v1182_v52 = vsub.f32 %v2595_v6, %v1137_v51  ;;  %v1183_v22 = vsub.f32 %v2597_v7, %v1137_v51 }
 0x357   : > { %v1216_v23 = vmul.f32 1.442695, %v1182_v52  ;;  %v1218_v53 = vmul.f32 1.442695, %v1183_v22  ;;  %v1435_v52 = vld [vmem:[#allocation4 + $0xf8] sm:$0xff]  ;;  %v1418_v22 = vld [vmem:[#allocation4 + $0x70] sm:$0xff] }
 0x358   : > { %1894 = vmatpush.msra.mxu3 %v1435_v52  ;;  %1879 = vmatpush.msra.mxu2 %v1418_v22 }
 0x359   : > { %1989 = vpow2.f32 %v1216_v23  ;;  %1501 = vmatpush.msrb.mxu1 %v1435_v52  ;;  %1437 = vmatpush.msrb.mxu0 %v1418_v22 }
 0x35a   : > { %1991 = vpow2.f32 %v1218_v53  ;;  %1880 = vmatpush.msra.mxu2 %v1417_v57 }
 0x35b   : > { %1438 = vmatpush.msrb.mxu0 %v1417_v57 }
 0x35c   : > { %v1140_v54 = vpop.xlane.xlu0 %1139 }
 0x35d   : > { %v1184_v55 = vsub.f32 %v2604_v12, %v1140_v54  ;;  %v1185_v56 = vsub.f32 %v2606_v13, %v1140_v54  ;;  %v1020_v12 = vpop.f32.mrf.mxu0  ;;  %v1434_v54 = vld [vmem:[#allocation4 + $0xf0] sm:$0xff] }
 0x35e   : > { %v2701_v35 = vmul.f32 0.5, %v1020_v12  ;;  %1895 = vmatpush.msra.mxu3 %v1434_v54  ;;  %1502 = vmatpush.msrb.mxu1 %v1434_v54  ;;  %v1431_v12 = vld [vmem:[#allocation4 + $0xd8] sm:$0xff] }
 0x35f   : > { %v2659_v59 = vpop.eup %1989  ;;  %v1220_v60 = vmul.f32 1.442695, %v1184_v55  ;;  %v1222_v61 = vmul.f32 1.442695, %v1185_v56 }
 0x360   : > { %v2661_v62 = vpop.eup %1991  ;;  %v1165_v49 = vmax.f32 %v2701_v35, %v2703_v36 }
 0x361   : > { %1993 = vpow2.f32 %v1220_v60  ;;  %v1279_v63 = vadd.f32 %v2661_v62, %v2659_v59 }
 0x362   : > { %1995 = vpow2.f32 %v1222_v61 }
 0x363   : > { %1280 = vadd.xlane.f32.xlu1 %v1279_v63 }
 0x364   : > { %v1143_v5 = vpop.xlane.xlu1 %1142 }
 0x365   : > { %v1186_v6 = vsub.f32 %v2613_v18, %v1143_v5  ;;  %v1187_v7 = vsub.f32 %v2615_v19, %v1143_v5  ;;  %v2681_v18 = vmul.f32 0.5, %v1082_v58  ;;  %v2684_v19 = vmul.f32 0.5, %v2588_v0  ;;  %v1023_v34 = vpop.f32.mrf.mxu0  ;;  %v1433_v58 = vld [vmem:[#allocation4 + $0xe8] sm:$0xff] }
 0x366   : > { %v2715_v51 = vmul.f32 0.5, %v1023_v34  ;;  %1896 = vmatpush.msra.mxu3 %v1433_v58  ;;  %1503 = vmatpush.msrb.mxu1 %v1433_v58  ;;  %v1425_v58 = vld [vmem:[#allocation4 + $0xa8] sm:$0xff] }
 0x367   : > { %v2671_v8 = vpop.eup %1993  ;;  %v1224_v9 = vmul.f32 1.442695, %v1186_v6  ;;  %v1226_v10 = vmul.f32 1.442695, %v1187_v7  ;;  %v1162_v31 = vmax.f32 %v2679_v17, %v2681_v18  ;;  %v1132_v1 = vmax.f32 %v2684_v19, %v2687_v20  ;;  %v1416_v6 = vld [vmem:[#allocation4 + $0x60] sm:$0xff] }
 0x368   : > { %v2675_v13 = vpop.eup %1995  ;;  %1881 = vmatpush.msra.mxu2 %v1416_v6  ;;  %1439 = vmatpush.msrb.mxu0 %v1416_v6 }
 0x369   : > { %1997 = vpow2.f32 %v1224_v9  ;;  %v1282_v15 = vadd.f32 %v2675_v13, %v2671_v8  ;;  %v1415_v9 = vld [vmem:[#allocation4 + $0x58] sm:$0xff] }
 0x36a   : > { %1999 = vpow2.f32 %v1226_v10  ;;  %1882 = vmatpush.msra.mxu2 %v1415_v9  ;;  %1440 = vmatpush.msrb.mxu0 %v1415_v9 }
 0x36b   : > { %1283 = vadd.xlane.f32.xlu0 %v1282_v15  ;;  %1160 = vmax.xlane.f32.xlu1 %v1159_v11 }
 0x36c   : > { %v1146_v16 = vpop.xlane.xlu1 %1145  ;;  %1883 = vmatpush.msra.mxu2 %v1414_v14  ;;  %1441 = vmatpush.msrb.mxu0 %v1414_v14  ;;  %v1408_v14 = vld [vmem:[#allocation4 + $0x20] sm:$0xff] }
 0x36d   : > { %v1188_v21 = vsub.f32 %v2622_v26, %v1146_v16  ;;  %v1189_v24 = vsub.f32 %v2624_v27, %v1146_v16  ;;  %v1088_v26 = vpop.f32.mrf.mxu1 }
 0x36f   : > { %v2691_v25 = vpop.eup %1997  ;;  %v1228_v28 = vmul.f32 1.442695, %v1188_v21  ;;  %v1230_v29 = vmul.f32 1.442695, %v1189_v24  ;;  %v1430_v24 = vld [vmem:[#allocation4 + $0xd0] sm:$0xff] }
 0x370   : > { %v2693_v30 = vpop.eup %1999 }
 0x371   : > { %2001 = vpow2.f32 %v1228_v28  ;;  %v1285_v0 = vadd.f32 %v2693_v30, %v2691_v25  ;;  %v1413_v28 = vld [vmem:[#allocation4 + $0x48] sm:$0xff] }
 0x372   : > { %2003 = vpow2.f32 %v1230_v29  ;;  %1884 = vmatpush.msra.mxu2 %v1413_v28  ;;  %1442 = vmatpush.msrb.mxu0 %v1413_v28  ;;  %v1422_v28 = vld [vmem:[#allocation4 + $0x90] sm:$0xff] }
 0x373   : > { %1286 = vadd.xlane.f32.xlu2 %v1285_v0  ;;  %1133 = vmax.xlane.f32.xlu1 %v1132_v1 }
 0x374   : > { %1163 = vmax.xlane.f32.xlu0 %v1162_v31  ;;  %v1149_v27 = vpop.xlane.xlu2 %1148 }
 0x375   : > { %v1190_v39 = vsub.f32 %v2631_v32, %v1149_v27  ;;  %v1191_v40 = vsub.f32 %v2633_v33, %v1149_v27  ;;  %v2717_v32 = vmul.f32 0.5, %v1088_v26  ;;  %v1026_v33 = vpop.f32.mrf.mxu0  ;;  %v1091_v53 = vpop.f32.mrf.mxu1  ;;  %v1429_v27 = vld [vmem:[#allocation4 + $0xc8] sm:$0xff] }
 0x376   : > { %v2729_v10 = vmul.f32 0.5, %v1026_v33  ;;  %v2731_v11 = vmul.f32 0.5, %v1091_v53  ;;  %v1410_v33 = vld [vmem:[#allocation4 + $0x30] sm:$0xff]  ;;  %v1409_v53 = vld [vmem:[#allocation4 + $0x28] sm:$0xff] }
 0x377   : > { %v2707_v41 = vpop.eup %2001  ;;  %v1232_v44 = vmul.f32 1.442695, %v1190_v39  ;;  %v1234_v45 = vmul.f32 1.442695, %v1191_v40  ;;  %v1168_v5 = vmax.f32 %v2715_v51, %v2717_v32  ;;  %v1412_v39 = vld [vmem:[#allocation4 + $0x40] sm:$0xff] }
 0x378   : > { %v2709_v46 = vpop.eup %2003  ;;  %v1171_v26 = vmax.f32 %v2729_v10, %v2731_v11  ;;  %v1428_v40 = vld [vmem:[#allocation4 + $0xc0] sm:$0xff]  ;;  %1885 = vmatpush.msra.mxu2 %v1412_v39  ;;  %1443 = vmatpush.msrb.mxu0 %v1412_v39 }
 0x379   : > { %2005 = vpow2.f32 %v1232_v44  ;;  %v1288_v50 = vadd.f32 %v2709_v46, %v2707_v41  ;;  %v1411_v44 = vld [vmem:[#allocation4 + $0x38] sm:$0xff] }
 0x37a   : > { %2007 = vpow2.f32 %v1234_v45  ;;  %1886 = vmatpush.msra.mxu2 %v1411_v44  ;;  %1444 = vmatpush.msrb.mxu0 %v1411_v44 }
 0x37b   : > { %1289 = vadd.xlane.f32.xlu2 %v1288_v50  ;;  %v1427_v50 = vld [vmem:[#allocation4 + $0xb8] sm:$0xff] }
 0x37c   : > { %1166 = vmax.xlane.f32.xlu0 %v1165_v49  ;;  %v1152_v23 = vpop.xlane.xlu2 %1151  ;;  %1887 = vmatpush.msra.mxu2 %v1410_v33 }
 0x37d   : > { %v1192_v55 = vsub.f32 %v2637_v37, %v1152_v23  ;;  %v1193_v56 = vsub.f32 %v2639_v38, %v1152_v23  ;;  %v1432_v38 = vld [vmem:[#allocation4 + $0xe0] sm:$0xff]  ;;  %v1029_v29 = vpop.f32.mrf.mxu0  ;;  %v1094_v31 = vpop.f32.mrf.mxu1  ;;  %v1426_v23 = vld [vmem:[#allocation4 + $0xb0] sm:$0xff]  ;;  %1445 = vmatpush.msrb.mxu0 %v1410_v33 }
 0x37e   : > { %1897 = vmatpush.msra.mxu3 %v1432_v38  ;;  %1504 = vmatpush.msrb.mxu1 %v1432_v38  ;;  %v2743_v45 = vmul.f32 0.5, %v1029_v29  ;;  %v2745_v49 = vmul.f32 0.5, %v1094_v31  ;;  %v1405_v29 = vld [vmem:[#allocation4 + $0x8] sm:$0xff] }
 0x37f   : > { %v2721_v60 = vpop.eup %2005  ;;  %v1236_v61 = vmul.f32 1.442695, %v1192_v55  ;;  %v1238_v63 = vmul.f32 1.442695, %v1193_v56  ;;  %1888 = vmatpush.msra.mxu2 %v1409_v53  ;;  %1446 = vmatpush.msrb.mxu0 %v1409_v53  ;;  %v1421_v31 = vld [vmem:[#allocation4 + $0x88] sm:$0xff] }
 0x380   : > { %v2725_v7 = vpop.eup %2007  ;;  %1898 = vmatpush.msra.mxu3 %v1431_v12  ;;  %1505 = vmatpush.msrb.mxu1 %v1431_v12  ;;  %v1174_v57 = vmax.f32 %v2743_v45, %v2745_v49 }
 0x381   : > { %2009 = vpow2.f32 %v1236_v61  ;;  %v1291_v37 = vadd.f32 %v2725_v7, %v2721_v60  ;;  %1889 = vmatpush.msra.mxu2 %v1408_v14  ;;  %1447 = vmatpush.msrb.mxu0 %v1408_v14 }
 0x382   : > { %2011 = vpow2.f32 %v1238_v63  ;;  %1899 = vmatpush.msra.mxu3 %v1430_v24  ;;  %1506 = vmatpush.msrb.mxu1 %v1430_v24  ;;  %v1406_v24 = vld [vmem:[#allocation4 + $0x10] sm:$0xff] }
 0x383   : > { %1292 = vadd.xlane.f32.xlu1 %v1291_v37  ;;  %1169 = vmax.xlane.f32.xlu2 %v1168_v5 }
 0x384   : > { %v1155_v15 = vpop.xlane.xlu0 %1154  ;;  %1900 = vmatpush.msra.mxu3 %v1429_v27  ;;  %1507 = vmatpush.msrb.mxu1 %v1429_v27 }
 0x385   : > { %v1194_v16 = vsub.f32 %v2643_v42, %v1155_v15  ;;  %v1195_v21 = vsub.f32 %v2645_v43, %v1155_v15  ;;  %v1424_v15 = vld [vmem:[#allocation4 + $0xa0] sm:$0xff] }
 0x386   : > { %1901 = vmatpush.msra.mxu3 %v1428_v40  ;;  %1508 = vmatpush.msrb.mxu1 %v1428_v40 }
 0x387   : > { %v2735_v0 = vpop.eup %2009  ;;  %v1240_v1 = vmul.f32 1.442695, %v1194_v16  ;;  %v1242_v34 = vmul.f32 1.442695, %v1195_v21  ;;  %v1407_v16 = vld [vmem:[#allocation4 + $0x18] sm:$0xff] }
 0x388   : > { %v2739_v42 = vpop.eup %2011  ;;  %1902 = vmatpush.msra.mxu3 %v1427_v50  ;;  %1509 = vmatpush.msrb.mxu1 %v1427_v50  ;;  %v1423_v21 = vld [vmem:[#allocation4 + $0x98] sm:$0xff] }
 0x389   : > { %2013 = vpow2.f32 %v1240_v1  ;;  %v1294_v43 = vadd.f32 %v2739_v42, %v2735_v0  ;;  %1890 = vmatpush.msra.mxu2 %v1407_v16  ;;  %1448 = vmatpush.msrb.mxu0 %v1407_v16  ;;  %v1404_v1 = vld [vmem:[#allocation4] sm:$0xff] }
 0x38a   : > { %2015 = vpow2.f32 %v1242_v34  ;;  %1903 = vmatpush.msra.mxu3 %v1426_v23  ;;  %1510 = vmatpush.msrb.mxu1 %v1426_v23  ;;  %v1420_v34 = vld [vmem:[#allocation4 + $0x80] sm:$0xff] }
 0x38b   : > { %1295 = vadd.xlane.f32.xlu0 %v1294_v43  ;;  %1172 = vmax.xlane.f32.xlu1 %v1171_v26 }
 0x38c   : > { %v1158_v4 = vpop.xlane.xlu2 %1157  ;;  %1904 = vmatpush.msra.mxu3 %v1425_v58  ;;  %1511 = vmatpush.msrb.mxu1 %v1425_v58 }
 0x38d   : > { %v1196_v52 = vsub.f32 %v2649_v47, %v1158_v4  ;;  %v1197_v22 = vsub.f32 %v2651_v48, %v1158_v4  ;;  %v1032_v47 = vpop.f32.mrf.mxu0  ;;  %v1097_v48 = vpop.f32.mrf.mxu1  ;;  %1891 = vmatpush.msra.mxu2 %v1406_v24  ;;  %1449 = vmatpush.msrb.mxu0 %v1406_v24 }
 0x38e   : > { %v2757_v5 = vmul.f32 0.5, %v1032_v47  ;;  %v2759_v6 = vmul.f32 0.5, %v1097_v48  ;;  %1905 = vmatpush.msra.mxu3 %v1424_v15  ;;  %1512 = vmatpush.msrb.mxu1 %v1424_v15 }
 0x38f   : > { %v2749_v54 = vpop.eup %2013  ;;  %v1244_v55 = vmul.f32 1.442695, %v1196_v52  ;;  %v1246_v56 = vmul.f32 1.442695, %v1197_v22  ;;  %1892 = vmatpush.msra.mxu2 %v1405_v29  ;;  %1450 = vmatpush.msrb.mxu0 %v1405_v29 }
 0x390   : > { %v2753_v61 = vpop.eup %2015  ;;  %v1177_v38 = vmax.f32 %v2757_v5, %v2759_v6  ;;  %1906 = vmatpush.msra.mxu3 %v1423_v21  ;;  %1513 = vmatpush.msrb.mxu1 %v1423_v21 }
 0x391   : > { %2017 = vpow2.f32 %v1244_v55  ;;  %v1297_v63 = vadd.f32 %v2753_v61, %v2749_v54  ;;  %1893 = vmatpush.msra.mxu2 %v1404_v1  ;;  %1451 = vmatpush.msrb.mxu0 %v1404_v1 }
 0x392   : > { %2019 = vpow2.f32 %v1246_v56  ;;  %1907 = vmatpush.msra.mxu3 %v1422_v28  ;;  %1514 = vmatpush.msrb.mxu1 %v1422_v28 }
 0x393   : > { %1298 = vadd.xlane.f32.xlu2 %v1297_v63  ;;  %1175 = vmax.xlane.f32.xlu0 %v1174_v57 }
 0x394   : > { %1908 = vmatpush.msra.mxu3 %v1421_v31  ;;  %1515 = vmatpush.msrb.mxu1 %v1421_v31 }
 0x396   : > { %1909 = vmatpush.msra.mxu3 %v1420_v34  ;;  %1516 = vmatpush.msrb.mxu1 %v1420_v34 }
 0x397   : > { %v2761_v37 = vpop.eup %2017 }
 0x398   : > { %v2765_v9 = vpop.eup %2019 }
 0x399   : > { %v1300_v12 = vadd.f32 %v2765_v9, %v2761_v37 }
 0x39b   : > { %1301 = vadd.xlane.f32.xlu1 %v1300_v12  ;;  %1178 = vmax.xlane.f32.xlu2 %v1177_v38 }
 0x3d6   : > { %v1281_v26 = vpop.xlane.xlu1 %1280 }
 0x3d7   : > { %2021 = vrcp.f32 %v1281_v26 }
 0x3dd   : > { %v2022_v27 = vpop.eup %2021 }
 0x3de   : > { %v1284_v39 = vpop.xlane.xlu0 %1283  ;;  %v1161_v43 = vpop.xlane.xlu1 %1160  ;;  %v1342_v40 = vmul.f32 %v2022_v27, %v2659_v59  ;;  %v1343_v44 = vmul.f32 %v2022_v27, %v2661_v62 }
 0x3df   : > { %2023 = vrcp.f32 %v1284_v39  ;;  %v1198_v50 = vsub.f32 %v2665_v2, %v1161_v43  ;;  %v1199_v33 = vsub.f32 %v2667_v3, %v1161_v43 }
 0x3e0   : > { %1455 = vmatmul.f32.vlgmr.msra.gmra.mxu2 %v1342_v40  ;;  %v1373_v4 = vpack.c.bf16 %v1343_v44, %v1342_v40  ;;  %1520 = vmatmul.f32.vlgmr.msra.gmra.mxu3 %v1343_v44 }
 0x3e1   : > { %v1248_v52 = vmul.f32 1.442695, %v1198_v50  ;;  %v1250_v22 = vmul.f32 1.442695, %v1199_v33 }
 0x3e2   : > { %1389 = vst [vmem:[%s2325_s13 + $0x8] sm:$0xff] %v1373_v4 }
 0x3e3   : > { %2025 = vpow2.f32 %v1248_v52 }
 0x3e4   : > { %2027 = vpow2.f32 %v1250_v22 }
 0x3e5   : > { %v2024_v23 = vpop.eup %2023 }
 0x3e6   : > { %v1287_v53 = vpop.xlane.xlu2 %1286  ;;  %v1134_v55 = vpop.xlane.xlu1 %1133  ;;  %v1344_v59 = vmul.f32 %v2024_v23, %v2671_v8  ;;  %v1345_v62 = vmul.f32 %v2024_v23, %v2675_v13 }
 0x3e7   : > { %2029 = vrcp.f32 %v1287_v53  ;;  %v1180_v2 = vsub.f32 %v2684_v19, %v1134_v55  ;;  %v1181_v3 = vsub.f32 %v2687_v20, %v1134_v55  ;;  %v1164_v56 = vpop.xlane.xlu0 %1163 }
 0x3e8   : > { %v1200_v57 = vsub.f32 %v2679_v17, %v1164_v56  ;;  %v1201_v58 = vsub.f32 %v2681_v18, %v1164_v56  ;;  %1458 = vmatmul.f32.gmra.mxu2 %v1344_v59  ;;  %v1374_v47 = vpack.c.bf16 %v1345_v62, %v1344_v59  ;;  %1523 = vmatmul.f32.gmra.mxu3 %v1345_v62 }
 0x3e9   : > { %v2780_v48 = vpop.eup %2025  ;;  %v1212_v63 = vmul.f32 1.442695, %v1180_v2  ;;  %v1214_v8 = vmul.f32 1.442695, %v1181_v3 }
 0x3ea   : > { %v2782_v38 = vpop.eup %2027  ;;  %v1252_v13 = vmul.f32 1.442695, %v1200_v57  ;;  %v1254_v12 = vmul.f32 1.442695, %v1201_v58  ;;  %1390 = vst [vmem:[%s2325_s13 + $0x10] sm:$0xff] %v1374_v47 }
 0x3eb   : > { %2031 = vpow2.f32 %v1212_v63  ;;  %v1303_v19 = vadd.f32 %v2782_v38, %v2780_v48 }
 0x3ec   : > { %2033 = vpow2.f32 %v1214_v8 }
 0x3ed   : > { %v2030_v17 = vpop.eup %2029  ;;  %2035 = vpow2.f32 %v1252_v13  ;;  %1304 = vadd.xlane.f32.xlu0 %v1303_v19 }
 0x3ee   : > { %2037 = vpow2.f32 %v1254_v12  ;;  %v1290_v18 = vpop.xlane.xlu2 %1289  ;;  %v1346_v20 = vmul.f32 %v2030_v17, %v2691_v25  ;;  %v1347_v14 = vmul.f32 %v2030_v17, %v2693_v30 }
 0x3ef   : > { %2039 = vrcp.f32 %v1290_v18  ;;  %v1167_v15 = vpop.xlane.xlu0 %1166 }
 0x3f0   : > { %v1202_v16 = vsub.f32 %v2701_v35, %v1167_v15  ;;  %v1203_v21 = vsub.f32 %v2703_v36, %v1167_v15  ;;  %1461 = vmatmul.f32.gmra.mxu2 %v1346_v20  ;;  %v1375_v24 = vpack.c.bf16 %v1347_v14, %v1346_v20  ;;  %1526 = vmatmul.f32.gmra.mxu3 %v1347_v14 }
 0x3f1   : > { %v2791_v28 = vpop.eup %2031 }
 0x3f2   : > { %v2793_v29 = vpop.eup %2033  ;;  %v1256_v31 = vmul.f32 1.442695, %v1202_v16  ;;  %v1258_v1 = vmul.f32 1.442695, %v1203_v21  ;;  %1391 = vst [vmem:[%s2325_s13 + $0x18] sm:$0xff] %v1375_v24 }
 0x3f3   : > { %v2796_v34 = vpop.eup %2035  ;;  %v1276_v25 = vadd.f32 %v2793_v29, %v2791_v28 }
 0x3f4   : > { %v2800_v30 = vpop.eup %2037  ;;  %2041 = vpow2.f32 %v1256_v31 }
 0x3f5   : > { %v2040_v35 = vpop.eup %2039  ;;  %2043 = vpow2.f32 %v1258_v1  ;;  %v1306_v36 = vadd.f32 %v2800_v30, %v2796_v34  ;;  %1277 = vadd.xlane.f32.xlu2 %v1276_v25 }
 0x3f6   : > { %v1293_v26 = vpop.xlane.xlu1 %1292  ;;  %v1170_v27 = vpop.xlane.xlu2 %1169  ;;  %v1348_v39 = vmul.f32 %v2040_v35, %v2707_v41  ;;  %v1349_v43 = vmul.f32 %v2040_v35, %v2709_v46 }
 0x3f7   : > { %1307 = vadd.xlane.f32.xlu1 %v1306_v36  ;;  %2045 = vrcp.f32 %v1293_v26  ;;  %v1204_v40 = vsub.f32 %v2715_v51, %v1170_v27  ;;  %v1205_v44 = vsub.f32 %v2717_v32, %v1170_v27 }
 0x3f8   : > { %1464 = vmatmul.f32.gmra.mxu2 %v1348_v39  ;;  %v1376_v50 = vpack.c.bf16 %v1349_v43, %v1348_v39  ;;  %1529 = vmatmul.f32.gmra.mxu3 %v1349_v43 }
 0x3f9   : > { %v1260_v33 = vmul.f32 1.442695, %v1204_v40  ;;  %v1262_v4 = vmul.f32 1.442695, %v1205_v44 }
 0x3fa   : > { %v2808_v52 = vpop.eup %2041  ;;  %1392 = vst [vmem:[%s2325_s13 + $0x20] sm:$0xff] %v1376_v50 }
 0x3fb   : > { %v2811_v22 = vpop.eup %2043  ;;  %2047 = vpow2.f32 %v1260_v33 }
 0x3fc   : > { %2049 = vpow2.f32 %v1262_v4  ;;  %v1309_v41 = vadd.f32 %v2811_v22, %v2808_v52 }
 0x3fd   : > { %v2046_v46 = vpop.eup %2045 }
 0x3fe   : > { %1310 = vadd.xlane.f32.xlu0 %v1309_v41  ;;  %v1296_v51 = vpop.xlane.xlu0 %1295  ;;  %v1173_v32 = vpop.xlane.xlu1 %1172  ;;  %v1350_v23 = vmul.f32 %v2046_v46, %v2721_v60  ;;  %v1351_v53 = vmul.f32 %v2046_v46, %v2725_v7 }
 0x3ff   : > { %2051 = vrcp.f32 %v1296_v51  ;;  %v1206_v55 = vsub.f32 %v2729_v10, %v1173_v32  ;;  %v1207_v59 = vsub.f32 %v2731_v11, %v1173_v32 }
 0x400   : > { %1467 = vmatmul.f32.gmra.mxu2 %v1350_v23  ;;  %v1377_v62 = vpack.c.bf16 %v1351_v53, %v1350_v23  ;;  %1532 = vmatmul.f32.gmra.mxu3 %v1351_v53 }
 0x401   : > { %v2819_v2 = vpop.eup %2047  ;;  %v1264_v3 = vmul.f32 1.442695, %v1206_v55  ;;  %v1266_v56 = vmul.f32 1.442695, %v1207_v59 }
 0x402   : > { %v2821_v57 = vpop.eup %2049  ;;  %1393 = vst [vmem:[%s2325_s13 + $0x28] sm:$0xff] %v1377_v62 }
 0x403   : > { %2053 = vpow2.f32 %v1264_v3  ;;  %v1312_v60 = vadd.f32 %v2821_v57, %v2819_v2 }
 0x404   : > { %2055 = vpow2.f32 %v1266_v56 }
 0x405   : > { %v2052_v7 = vpop.eup %2051  ;;  %1313 = vadd.xlane.f32.xlu1 %v1312_v60 }
 0x406   : > { %v1299_v10 = vpop.xlane.xlu2 %1298  ;;  %v1176_v11 = vpop.xlane.xlu0 %1175  ;;  %v1352_v58 = vmul.f32 %v2052_v7, %v2735_v0  ;;  %v1353_v47 = vmul.f32 %v2052_v7, %v2739_v42 }
 0x407   : > { %2057 = vrcp.f32 %v1299_v10  ;;  %v1208_v63 = vsub.f32 %v2743_v45, %v1176_v11  ;;  %v1209_v8 = vsub.f32 %v2745_v49, %v1176_v11 }
 0x408   : > { %1470 = vmatmul.f32.gmra.mxu2 %v1352_v58  ;;  %v1378_v13 = vpack.c.bf16 %v1353_v47, %v1352_v58  ;;  %1535 = vmatmul.f32.gmra.mxu3 %v1353_v47 }
 0x409   : > { %v2830_v12 = vpop.eup %2053  ;;  %v1268_v19 = vmul.f32 1.442695, %v1208_v63  ;;  %v1270_v17 = vmul.f32 1.442695, %v1209_v8 }
 0x40a   : > { %v2832_v18 = vpop.eup %2055  ;;  %1394 = vst [vmem:[%s2325_s13 + $0x30] sm:$0xff] %v1378_v13 }
 0x40b   : > { %2059 = vpow2.f32 %v1268_v19  ;;  %v1315_v0 = vadd.f32 %v2832_v18, %v2830_v12 }
 0x40c   : > { %2061 = vpow2.f32 %v1270_v17 }
 0x40d   : > { %v2058_v42 = vpop.eup %2057  ;;  %1316 = vadd.xlane.f32.xlu2 %v1315_v0 }
 0x40e   : > { %v1302_v45 = vpop.xlane.xlu1 %1301  ;;  %v1179_v49 = vpop.xlane.xlu2 %1178  ;;  %v1354_v20 = vmul.f32 %v2058_v42, %v2749_v54  ;;  %v1355_v14 = vmul.f32 %v2058_v42, %v2753_v61 }
 0x40f   : > { %2063 = vrcp.f32 %v1302_v45  ;;  %v1210_v15 = vsub.f32 %v2757_v5, %v1179_v49  ;;  %v1211_v16 = vsub.f32 %v2759_v6, %v1179_v49 }
 0x410   : > { %1473 = vmatmul.f32.gmra.mxu2 %v1354_v20  ;;  %v1379_v21 = vpack.c.bf16 %v1355_v14, %v1354_v20  ;;  %1538 = vmatmul.f32.gmra.mxu3 %v1355_v14 }
 0x411   : > { %v2841_v24 = vpop.eup %2059  ;;  %v1272_v31 = vmul.f32 1.442695, %v1210_v15  ;;  %v1274_v1 = vmul.f32 1.442695, %v1211_v16 }
 0x412   : > { %v2843_v25 = vpop.eup %2061  ;;  %1395 = vst [vmem:[%s2325_s13 + $0x38] sm:$0xff] %v1379_v21 }
 0x413   : > { %2065 = vpow2.f32 %v1272_v31  ;;  %v1318_v54 = vadd.f32 %v2843_v25, %v2841_v24 }
 0x414   : > { %2067 = vpow2.f32 %v1274_v1 }
 0x415   : > { %v2064_v61 = vpop.eup %2063  ;;  %1319 = vadd.xlane.f32.xlu0 %v1318_v54 }
 0x416   : > { %v1356_v5 = vmul.f32 %v2064_v61, %v2761_v37  ;;  %v1357_v6 = vmul.f32 %v2064_v61, %v2765_v9 }
 0x418   : > { %1476 = vmatmul.f32.gmra.mxu2 %v1356_v5  ;;  %v1380_v35 = vpack.c.bf16 %v1357_v6, %v1356_v5  ;;  %1541 = vmatmul.f32.gmra.mxu3 %v1357_v6 }
 0x419   : > { %v2850_v36 = vpop.eup %2065 }
 0x41a   : > { %v2852_v26 = vpop.eup %2067  ;;  %1396 = vst [vmem:[%s2325_s13 + $0x40] sm:$0xff] %v1380_v35 }
 0x41b   : > { %v1321_v27 = vadd.f32 %v2852_v26, %v2850_v36 }
 0x41d   : > { %1322 = vadd.xlane.f32.xlu1 %v1321_v27 }
 0x460   : > { %v1305_v39 = vpop.xlane.xlu0 %1304 }
 0x461   : > { %2069 = vrcp.f32 %v1305_v39 }
 0x463   : > { %v1456_v19 = vpop.f32.mrf.mxu2  ;;  %v1521_v17 = vpop.f32.mrf.mxu3 }
 0x464   : > { %v1522_v15 = vadd.f32 %v1521_v17, %v1456_v19 }
 0x467   : > { %v2070_v43 = vpop.eup %2069 }
 0x468   : > { %v1278_v40 = vpop.xlane.xlu2 %1277  ;;  %v1358_v37 = vmul.f32 %v2070_v43, %v2780_v48  ;;  %v1359_v9 = vmul.f32 %v2070_v43, %v2782_v38 }
 0x469   : > { %2071 = vrcp.f32 %v1278_v40 }
 0x46a   : > { %v1308_v44 = vpop.xlane.xlu1 %1307  ;;  %1479 = vmatmul.f32.gmra.mxu2 %v1358_v37  ;;  %v1381_v50 = vpack.c.bf16 %v1359_v9, %v1358_v37  ;;  %1544 = vmatmul.f32.gmra.mxu3 %v1359_v9 }
 0x46b   : > { %2073 = vrcp.f32 %v1308_v44  ;;  %v1524_v0 = vpop.f32.mrf.mxu3 }
 0x46c   : > { %1397 = vst [vmem:[%s2325_s13 + $0x48] sm:$0xff] %v1381_v50 }
 0x46f   : > { %v2072_v33 = vpop.eup %2071 }
 0x470   : > { %v1340_v4 = vmul.f32 %v2072_v33, %v2791_v28  ;;  %v1341_v41 = vmul.f32 %v2072_v33, %v2793_v29 }
 0x471   : > { %v2074_v46 = vpop.eup %2073  ;;  %v1311_v51 = vpop.xlane.xlu0 %1310 }
 0x472   : > { %2075 = vrcp.f32 %v1311_v51  ;;  %1452 = vmatmul.f32.vlgmr.msrb.gmra.mxu0 %v1340_v4  ;;  %v1360_v48 = vmul.f32 %v2074_v46, %v2796_v34  ;;  %v1372_v38 = vpack.c.bf16 %v1341_v41, %v1340_v4  ;;  %1517 = vmatmul.f32.vlgmr.msrb.gmra.mxu1 %v1341_v41  ;;  %v1361_v32 = vmul.f32 %v2074_v46, %v2800_v30 }
 0x473   : > { %v1527_v45 = vpop.f32.mrf.mxu3 }
 0x474   : > { %1482 = vmatmul.f32.gmra.mxu2 %v1360_v48  ;;  %1388 = vst [vmem:[%s2325_s13] sm:$0xff] %v1372_v38  ;;  %v1382_v23 = vpack.c.bf16 %v1361_v32, %v1360_v48  ;;  %1547 = vmatmul.f32.gmra.mxu3 %v1361_v32 }
 0x476   : > { %1398 = vst [vmem:[%s2325_s13 + $0x50] sm:$0xff] %v1382_v23 }
 0x478   : > { %v2076_v53 = vpop.eup %2075  ;;  %v1314_v28 = vpop.xlane.xlu1 %1313 }
 0x479   : > { %2077 = vrcp.f32 %v1314_v28  ;;  %v1362_v29 = vmul.f32 %v2076_v53, %v2808_v52  ;;  %v1363_v55 = vmul.f32 %v2076_v53, %v2811_v22 }
 0x47b   : > { %v1383_v59 = vpack.c.bf16 %v1363_v55, %v1362_v29  ;;  %v1530_v21 = vpop.f32.mrf.mxu3 }
 0x47c   : > { %1485 = vmatmul.f32.gmra.mxu2 %v1362_v29  ;;  %1550 = vmatmul.f32.gmra.mxu3 %v1363_v55 }
 0x47d   : > { %1399 = vst [vmem:[%s2325_s13 + $0x58] sm:$0xff] %v1383_v59 }
 0x47f   : > { %v2078_v34 = vpop.eup %2077 }
 0x480   : > { %v1317_v30 = vpop.xlane.xlu2 %1316  ;;  %v1364_v62 = vmul.f32 %v2078_v34, %v2819_v2  ;;  %v1365_v3 = vmul.f32 %v2078_v34, %v2821_v57 }
 0x481   : > { %2079 = vrcp.f32 %v1317_v30 }
 0x482   : > { %v1384_v56 = vpack.c.bf16 %v1365_v3, %v1364_v62 }
 0x483   : > { %v1533_v1 = vpop.f32.mrf.mxu3 }
 0x484   : > { %1488 = vmatmul.f32.gmra.mxu2 %v1364_v62  ;;  %1400 = vst [vmem:[%s2325_s13 + $0x60] sm:$0xff] %v1384_v56  ;;  %1553 = vmatmul.f32.gmra.mxu3 %v1365_v3 }
 0x487   : > { %v2080_v60 = vpop.eup %2079 }
 0x488   : > { %v1320_v52 = vpop.xlane.xlu0 %1319  ;;  %v1366_v22 = vmul.f32 %v2080_v60, %v2830_v12  ;;  %v1367_v7 = vmul.f32 %v2080_v60, %v2832_v18  ;;  %v1459_v18 = vpop.f32.mrf.mxu2 }
 0x489   : > { %2081 = vrcp.f32 %v1320_v52 }
 0x48a   : > { %v1385_v10 = vpack.c.bf16 %v1367_v7, %v1366_v22 }
 0x48b   : > { %v1536_v61 = vpop.f32.mrf.mxu3 }
 0x48c   : > { %1491 = vmatmul.f32.gmra.mxu2 %v1366_v22  ;;  %1401 = vst [vmem:[%s2325_s13 + $0x68] sm:$0xff] %v1385_v10  ;;  %1556 = vmatmul.f32.gmra.mxu3 %v1367_v7 }
 0x48f   : > { %v2082_v2 = vpop.eup %2081 }
 0x490   : > { %v1323_v57 = vpop.xlane.xlu1 %1322  ;;  %v1368_v11 = vmul.f32 %v2082_v2, %v2841_v24  ;;  %v1369_v58 = vmul.f32 %v2082_v2, %v2843_v25  ;;  %v1462_v42 = vpop.f32.mrf.mxu2  ;;  %v1525_v24 = vadd.f32 %v1524_v0, %v1459_v18 }
 0x491   : > { %2083 = vrcp.f32 %v1323_v57  ;;  %v1528_v25 = vadd.f32 %v1527_v45, %v1462_v42 }
 0x492   : > { %v1386_v47 = vpack.c.bf16 %v1369_v58, %v1368_v11 }
 0x494   : > { %1494 = vmatmul.f32.gmra.mxu2 %v1368_v11  ;;  %1402 = vst [vmem:[%s2325_s13 + $0x70] sm:$0xff] %v1386_v47  ;;  %1559 = vmatmul.f32.gmra.mxu3 %v1369_v58 }
 0x497   : > { %v2084_v63 = vpop.eup %2083 }
 0x498   : > { %v1370_v8 = vmul.f32 %v2084_v63, %v2850_v36  ;;  %v1371_v13 = vmul.f32 %v2084_v63, %v2852_v26  ;;  %v1465_v16 = vpop.f32.mrf.mxu2 }
 0x499   : > { %v1531_v5 = vadd.f32 %v1530_v21, %v1465_v16 }
 0x49a   : > { %v1387_v12 = vpack.c.bf16 %v1371_v13, %v1370_v8 }
 0x49c   : > { %1497 = vmatmul.f32.gmra.mxu2 %v1370_v8  ;;  %1403 = vst [vmem:[%s2325_s13 + $0x78] sm:$0xff] %v1387_v12  ;;  %1562 = vmatmul.f32.gmra.mxu3 %v1371_v13 }
 0x4a0   : > { %v1468_v31 = vpop.f32.mrf.mxu2 }
 0x4a8   : > { %v1471_v54 = vpop.f32.mrf.mxu2 }
 0x4ef   : > { %v1453_v49 = vpop.f32.mrf.mxu0  ;;  %v1518_v20 = vpop.f32.mrf.mxu1 }
 0x4f0   : > { %v1519_v14 = vadd.f32 %v1518_v20, %v1453_v49 }
 0x4f2   : > { %1572 = vxpose.xlu2.b32.start [1/16] (narrow) %v1519_v14, 8 }
 0x4fa   : > { %1573 = vxpose.xlu2.b32.cont [2/16] (narrow) %v1522_v15, 8 }
 0x502   : > { %1574 = vxpose.xlu2.b32.cont [3/16] (narrow) %v1525_v24, 8 }
 0x50a   : > { %1575 = vxpose.xlu2.b32.cont [4/16] (narrow) %v1528_v25, 8 }
 0x512   : > { %1576 = vxpose.xlu2.b32.cont [5/16] (narrow) %v1531_v5, 8 }
 0x513   : > { %2112 = shalt.err (!%p2109_p9)
}
 0x514   : > { %s2182_s13 = smov 128   ;;  %s2183_s29 = smov 8   ;;  %v1474_v6 = vpop.f32.mrf.mxu2  ;;  %v1539_v35 = vpop.f32.mrf.mxu3  ;;  %v1534_v36 = vadd.f32 %v1533_v1, %v1468_v31  ;;  %v1537_v26 = vadd.f32 %v1536_v61, %v1471_v54 }
 0x515   : > { %1910 = dma.vmem_to_hbm [thread:$0]  (%p2288_p3), %s1636_s27, 2048, %s1638_s10, %s1617_s21, %s2182_s13, %s2182_s13, %s2183_s29   ;;  %v1540_v43 = vadd.f32 %v1539_v35, %v1474_v6 }
 0x516   : > { %s1571_s23 = sld [smem:[#allocation5]]  ;;  %s2955_s19 = sshll.u32 %s2163_s14, 7 }
 0x517   : > { %s1566_s22 = sshra.s32 %s2955_s19, 7 }
 0x518   : > { %s1866_s25 = sshll.u32 %s1566_s22, 3 }
 0x519   : > { %s1569_s27 = scalar_lea.vmem %s2318_s26, %s1866_s25 }
 0x51a   : > { %1577 = vxpose.xlu2.b32.cont [6/16] (narrow) %v1534_v36, 8  ;;  %v1570_v56 = vld [vmem:[%s1569_s27] sm:$0xff] }
 0x51c   : > { %v1477_v27 = vpop.f32.mrf.mxu2  ;;  %v1542_v39 = vpop.f32.mrf.mxu3  ;;  %v1604_v3 = vstv %s1571_s23 }
 0x51d   : > { %v1543_v9 = vadd.f32 %v1542_v39, %v1477_v27 }
 0x522   : > { %1578 = vxpose.xlu2.b32.cont [7/16] (narrow) %v1537_v26, 8 }
 0x524   : > { %v1480_v40 = vpop.f32.mrf.mxu2  ;;  %v1545_v37 = vpop.f32.mrf.mxu3 }
 0x525   : > { %v1546_v33 = vadd.f32 %v1545_v37, %v1480_v40 }
 0x52a   : > { %1579 = vxpose.xlu2.b32.cont [8/16] (narrow) %v1540_v43, 8 }
 0x52c   : > { %v1483_v44 = vpop.f32.mrf.mxu2  ;;  %v1548_v50 = vpop.f32.mrf.mxu3 }
 0x52d   : > { %v1549_v46 = vadd.f32 %v1548_v50, %v1483_v44 }
 0x532   : > { %1580 = vxpose.xlu2.b32.cont [9/16] (narrow) %v1543_v9, 8 }
 0x534   : > { %v1486_v4 = vpop.f32.mrf.mxu2  ;;  %v1551_v41 = vpop.f32.mrf.mxu3 }
 0x535   : > { %v1552_v38 = vadd.f32 %v1551_v41, %v1486_v4 }
 0x53a   : > { %1581 = vxpose.xlu2.b32.cont [10/16] (narrow) %v1546_v33, 8 }
 0x53c   : > { %v1489_v51 = vpop.f32.mrf.mxu2  ;;  %v1554_v48 = vpop.f32.mrf.mxu3 }
 0x53d   : > { %v1555_v32 = vadd.f32 %v1554_v48, %v1489_v51 }
 0x542   : > { %1582 = vxpose.xlu2.b32.cont [11/16] (narrow) %v1549_v46, 8 }
 0x544   : > { %v1492_v23 = vpop.f32.mrf.mxu2  ;;  %v1557_v53 = vpop.f32.mrf.mxu3 }
 0x545   : > { %v1558_v28 = vadd.f32 %v1557_v53, %v1492_v23 }
 0x54a   : > { %1583 = vxpose.xlu2.b32.cont [12/16] (narrow) %v1552_v38, 8 }
 0x54c   : > { %v1495_v29 = vpop.f32.mrf.mxu2  ;;  %v1560_v55 = vpop.f32.mrf.mxu3 }
 0x54d   : > { %v1561_v59 = vadd.f32 %v1560_v55, %v1495_v29 }
 0x552   : > { %1584 = vxpose.xlu2.b32.cont [13/16] (narrow) %v1555_v32, 8 }
 0x554   : > { %v1498_v34 = vpop.f32.mrf.mxu2  ;;  %v1563_v30 = vpop.f32.mrf.mxu3 }
 0x555   : > { %v1564_v62 = vadd.f32 %v1563_v30, %v1498_v34 }
 0x55a   : > { %1585 = vxpose.xlu2.b32.cont [14/16] (narrow) %v1558_v28, 8 }
 0x562   : > { %1586 = vxpose.xlu2.b32.cont [15/16] (narrow) %v1561_v59, 8 }
 0x56a   : > { %1587 = vxpose.xlu2.b32.end [16/16] (narrow) %v1564_v62, 8 }
 0x58b   : > { %v1588_v60 = vpop.trf.xlu2 }
 0x58c   : > { %v1605_v52 = vmul.f32 %v1604_v3, %v1588_v60 }
 0x58e   : > { %v1606_v22 = vadd.f32 %v1605_v52, %v1570_v56 }
 0x590   : > { %1607 = vst [vmem:[%s2323_s28] sm:$0xff] %v1606_v22 }
 0x591 PF: > { %p1916_p3 = scmp.ge.s32.totalorder %s2179_s18, 2  ;;  %s1663_s10 = sand.u32 1, %s2151_s11  }
 0x592   : > { %s1664_s21 = scalar_lea.sflag [#allocation7], %s1663_s10 }
 0x593   : > { %p1913_p10 = pnand %p1916_p3, %p2297_p8 }
 0x595   : > { %p1914_p11 = pneg %p1913_p10 }
 0x597   : > { %2146 = dma.done.wait (%p1914_p11), %s1664_s21, 2048  }
 0x598   : > { %2148 = vsyncadd (%p1914_p11), %s1664_s21, 4294965248  ;;  %s24_s18 = sadd.s32 1, %s2179_s18   ;;  %s2956_s14 = sld [smem:[#allocation9_spill]] }
 0x599   : > { %p21_p12 = scmp.ge.s32.totalorder %s24_s18, 6   ;;  %s2957_s13 = sld [smem:[#allocation14_spill]] }
 0x59a   : > { %s2958_s26 = sld [smem:[#allocation10_spill]]  ;;  %s2962_s11 = smov %s2155_s12 }
 0x59b   : > { %s2959_s15 = sld [smem:[#allocation11_spill]] }
 0x59c   : > { %s2960_s16 = sld [smem:[#allocation12_spill]]  ;;  %23 = sbr.rel (!%p21_p12) target bundleno = 7 (0x7), region = 105 }
 0x59d   : > { %s2961_s17 = sld [smem:[#allocation13_spill]] }
 0x59e   : > { %s2963_s12 = smov %s2956_s14 }
 0x5a0   : > { %s2964_s14 = smov %s2958_s26 }
 0x5a1   :  { %1670 = vsyncpa [#allocation7], 1 }
 0x5a2   :  { %1672 = vsyncpa [#allocation7 + $0x1], 1 }

</bundles_post_ra>
